<compile_context>
chip_gen: v7x
topology: tpu7x:2x2x1
jax: 0.10.0
libtpu: 0.0.40
codegen_flags: <defaults>
</compile_context>

<pallas_src>
import jax
import jax.numpy as jnp
from jax import lax
from jax.experimental import pallas as pl
from jax.experimental.pallas import tpu as pltpu

BN_EPS = 1e-5


# --------------------------------------------------------------------------------------
# Kernel
# --------------------------------------------------------------------------------------
def _up_block_kernel(x_ref, a1_ref, b1_ref, g1_ref, be1_ref,
                     a2_ref, b2_ref, g2_ref, be2_ref,
                     pool_ref, bcast_ref,
                     out_ref, y1_ref):
    """Fused (Conv3x3 pad=1 -> BN(batch stats) -> ReLU) x 2, lane-dense (N, H, W*C) layout.

    x_ref    : (N, H, W*Cin)        f32   input rows, channels packed along lanes
    a1_ref   : (W*Cin,  3*W*Cout)   bf16  row-conv weights, column block dy in {0,1,2}
    a2_ref   : (W*Cout, 3*W*Cout)   bf16
    b*/g*/be*: (1, W*Cout)          f32   conv bias / BN gamma / BN beta, lane-broadcast
    pool_ref : (W*Cout, Cout)       f32   pools lane-wise sums into per-channel sums
    bcast_ref: (Cout, W*Cout)       f32   broadcasts per-channel values back to lanes
    out_ref  : (N, H, W*Cout)       f32   output (lane-dense store)
    y1_ref   : (N, H, W*Cout)       f32   VMEM scratch: stage-1 accumulator / activation
    """
    N, H, _ = x_ref.shape
    Lout = out_ref.shape[-1]
    Cout = pool_ref.shape[-1]
    NH = N * H
    inv_m = 1.0 / float(NH * (Lout // Cout))          # 1 / (N*H*W): BN population size

    def conv3x3(src_ref, a_ref, dst_ref):
        """3x3 conv (stride 1, zero-pad 1): one MXU matmul + shifted row accumulation."""
        K = src_ref.shape[-1]
        lhs = src_ref[...].reshape(NH, K).astype(jnp.bfloat16)          # bf16 in, f32 acc
        t = jnp.dot(lhs, a_ref[...], preferred_element_type=jnp.float32)
        t = t.reshape(N, H, 3 * Lout)
        # dy = 1 (center tap) covers every output row: plain store, no zero-fill needed.
        dst_ref[...] = t[:, :, Lout:2 * Lout]
        # dy = 0: out[i] += x[i-1] @ A0 (valid i >= 1);  dy = 2: out[i] += x[i+1] @ A2.
        # Missing boundary rows are exactly the zero padding -> nothing to add.
        dst_ref[:, 1:, :] += t[:, :H - 1, :Lout]
        dst_ref[:, :H - 1, :] += t[:, 1:, 2 * Lout:]

    def bn_relu_inplace(ref, b_ref, g_ref, be_ref):
        """Training-mode BatchNorm (two-pass, per-channel batch stats) + ReLU, in place."""
        y = ref[...].reshape(NH, Lout) + b_ref[...]                      # conv bias
        row_sum = jnp.sum(y, axis=0, keepdims=True)                      # (1, W*Cout)
        mean_c = jnp.dot(row_sum, pool_ref[...]) * inv_m                 # (1, Cout)
        mean_l = jnp.dot(mean_c, bcast_ref[...])                         # (1, W*Cout)
        d = y - mean_l                                                   # centered -> stable var
        var_c = jnp.dot(jnp.sum(d * d, axis=0, keepdims=True), pool_ref[...]) * inv_m
        inv_std_l = lax.rsqrt(jnp.dot(var_c, bcast_ref[...]) + BN_EPS)   # rsqrt -> EUP slot
        z = d * inv_std_l * g_ref[...] + be_ref[...]
        ref[...] = jnp.maximum(z, 0.0).reshape(N, H, Lout)               # BN + ReLU

    # stage 1: conv -> BN -> ReLU into VMEM scratch (no HBM round trip, no padded buffer)
    conv3x3(x_ref, a1_ref, y1_ref)
    bn_relu_inplace(y1_ref, b1_ref, g1_ref, be1_ref)
    # stage 2: conv -> BN -> ReLU, accumulating directly into the (lane-dense) output ref
    conv3x3(y1_ref, a2_ref, out_ref)
    bn_relu_inplace(out_ref, b2_ref, g2_ref, be2_ref)


# --------------------------------------------------------------------------------------
# pallas_call wrapper
# --------------------------------------------------------------------------------------
def _padded_bytes(shape, itemsize):
    """Rough VMEM footprint: last dim padded to 128 lanes, 2nd-last to 8 sublanes."""
    dims = list(shape) if shape else [1]
    dims[-1] = -(-dims[-1] // 128) * 128
    if len(dims) >= 2:
        dims[-2] = -(-dims[-2] // 8) * 8
    n = 1
    for d in dims:
        n *= d
    return n * itemsize


def _up_block_pallas(x, a1, b1, g1, be1, a2, b2, g2, be2, pool, bcast):
    N, H, Lin = x.shape
    Lout = pool.shape[0]

    operands = (x, a1, b1, g1, be1, a2, b2, g2, be2, pool, bcast)

    # vmem limit derived from actual residency (inputs + output + scratch + matmul temps),
    # with 2x headroom for compiler temporaries; capped at v7x physical VMEM (64 MiB).
    vmem_bytes = sum(_padded_bytes(op.shape, op.dtype.itemsize) for op in operands)
    vmem_bytes += 2 * _padded_bytes((N, H, Lout), 4)          # output + stage-1 scratch
    vmem_bytes += 2 * _padded_bytes((N * H, 3 * Lout), 4)     # conv matmul temporaries
    vmem_limit = int(min(max(2 * vmem_bytes + (8 << 20), 16 << 20), 64 << 20))

    flops = 2 * N * H * 3 * Lout * (Lin + Lout)               # two stages of one fat matmul
    bytes_accessed = sum(int(op.size) * op.dtype.itemsize for op in operands) \
        + N * H * Lout * 4

    return pl.pallas_call(
        _up_block_kernel,
        out_shape=jax.ShapeDtypeStruct((N, H, Lout), jnp.float32),
        in_specs=[pl.BlockSpec(memory_space=pltpu.MemorySpace.VMEM)] * len(operands),
        out_specs=pl.BlockSpec(memory_space=pltpu.MemorySpace.VMEM),
        scratch_shapes=[pltpu.VMEM((N, H, Lout), jnp.float32)],   # stage-1 activation
        compiler_params=pltpu.CompilerParams(vmem_limit_bytes=vmem_limit),
        cost_estimate=pl.CostEstimate(flops=flops, transcendentals=2 * Lout,
                                      bytes_accessed=bytes_accessed),
    )(*operands)


# --------------------------------------------------------------------------------------
# Parameter / constant preparation (tiny, traced once under jit)
# --------------------------------------------------------------------------------------
def _row_conv_weights(w, W):
    """w: (3, 3, Cin, Cout) HWIO taps -> (W*Cin, 3*W*Cout) block-banded row-conv weights.

    A[j'*Cin + c, dy*(W*Cout) + j*Cout + o] = w[dy, dx, c, o] with j' = j + dx - 1
    (out-of-range horizontal taps are simply absent == zero padding).
    """
    Cin, Cout = w.shape[2], w.shape[3]
    jp = jnp.arange(W)[None, :, None]                    # source column j'
    j = jnp.arange(W)[None, None, :]                     # output column j
    dx = jnp.arange(3)[:, None, None]
    ind = (jp == j + dx - 1).astype(w.dtype)             # (3, W, W)  banded indicator
    a = jnp.einsum('xpj,yxio->piyjo', ind, w)            # (W, Cin, 3, W, Cout)
    return a.reshape(W * Cin, 3 * W * Cout)


def init_params(key, in_channel, out_channel):
    k = jax.random.split(key, 8)
    s1 = 1.0 / jnp.sqrt(in_channel * 9.0)
    s2 = 1.0 / jnp.sqrt(out_channel * 9.0)
    return {
        "w1": jax.random.normal(k[0], (3, 3, in_channel, out_channel), jnp.float32) * s1,
        "b1": jax.random.normal(k[1], (out_channel,), jnp.float32) * s1,
        "g1": 1.0 + 0.1 * jax.random.normal(k[2], (out_channel,), jnp.float32),
        "be1": 0.1 * jax.random.normal(k[3], (out_channel,), jnp.float32),
        "w2": jax.random.normal(k[4], (3, 3, out_channel, out_channel), jnp.float32) * s2,
        "b2": jax.random.normal(k[5], (out_channel,), jnp.float32) * s2,
        "g2": 1.0 + 0.1 * jax.random.normal(k[6], (out_channel,), jnp.float32),
        "be2": 0.1 * jax.random.normal(k[7], (out_channel,), jnp.float32),
    }


@jax.jit
def up_block_forward(x_nchw, params):
    """Matches UpBlock.forward: (Conv3x3 pad=1 -> BN(train stats) -> ReLU) x 2, NCHW in/out."""
    N, Cin, H, W = x_nchw.shape
    Cout = params["w1"].shape[-1]

    # NCHW -> lane-dense (N, H, W*Cin); no HBM zero-padding pass (halo handled in-kernel).
    x = jnp.transpose(x_nchw, (0, 2, 3, 1)).reshape(N, H, W * Cin)

    a1 = _row_conv_weights(params["w1"], W).astype(jnp.bfloat16)
    a2 = _row_conv_weights(params["w2"], W).astype(jnp.bfloat16)
    lane = lambda v: jnp.tile(v, W)[None, :]                     # (Cout,) -> (1, W*Cout)
    pool = jnp.tile(jnp.eye(Cout, dtype=jnp.float32), (W, 1))    # (W*Cout, Cout)
    bcast = pool.T                                               # (Cout, W*Cout)

    y = _up_block_pallas(
        x,
        a1, lane(params["b1"]), lane(params["g1"]), lane(params["be1"]),
        a2, lane(params["b2"]), lane(params["g2"]), lane(params["be2"]),
        pool, bcast)

    return jnp.transpose(y.reshape(N, H, W, Cout), (0, 3, 1, 2))  # -> NCHW
    # TODO(synk): BatchNorm running_mean/running_var buffer updates (PyTorch train-mode side
    # effect) are not emitted; only the normalized forward output is produced.


# --------------------------------------------------------------------------------------
# Pure-JAX reference (mirrors the kernel's bf16-input / f32-accumulation numerics)
# --------------------------------------------------------------------------------------
def _ref_block(x_nhwc, w, b, gamma, beta):
    y = lax.conv_general_dilated(
        x_nhwc.astype(jnp.bfloat16), w.astype(jnp.bfloat16), (1, 1), "SAME",
        dimension_numbers=("NHWC", "HWIO", "NHWC"),
        preferred_element_type=jnp.float32)
    y = y + b
    mean = jnp.mean(y, axis=(0, 1, 2), keepdims=True)
    var = jnp.mean((y - mean) ** 2, axis=(0, 1, 2), keepdims=True)
    y = (y - mean) * lax.rsqrt(var + BN_EPS) * gamma + beta
    return jnp.maximum(y, 0.0)


def ref_forward(x_nchw, params):
    x = jnp.transpose(x_nchw, (0, 2, 3, 1))
    y = _ref_block(x, params["w1"], params["b1"], params["g1"], params["be1"])
    z = _ref_block(y, params["w2"], params["b2"], params["g2"], params["be2"])
    return jnp.transpose(z, (0, 3, 1, 2))


if __name__ == "__main__":
    key = jax.random.PRNGKey(0)
    kx, kp = jax.random.split(key)

    batch, in_channel, out_channel, spatial = 2, 4, 8, 16
    x = jax.random.normal(kx, (batch, in_channel, spatial, spatial), jnp.float32)
    params = init_params(kp, in_channel, out_channel)

    out = jax.block_until_ready(up_block_forward(x, params))
    ref = jax.block_until_ready(ref_forward(x, params))

    assert out.shape == (batch, out_channel, spatial, spatial)
    # Tolerance reflects bf16 MXU inputs (f32 accumulation) in both kernel and reference.
    assert jnp.allclose(out, ref, rtol=1e-2, atol=1e-2), float(jnp.max(jnp.abs(out - ref)))

    print("KERNEL_OK")
</pallas_src>

<mosaic_0001>
module attributes {stable_mosaic.version = 11 : i64} {
  func.func @_up_block_kernel(%arg0: memref<2x16x64xf32, #tpu.memory_space<vmem>>, %arg1: memref<64x384xbf16, #tpu.memory_space<vmem>>, %arg2: memref<1x128xf32, #tpu.memory_space<vmem>>, %arg3: memref<1x128xf32, #tpu.memory_space<vmem>>, %arg4: memref<1x128xf32, #tpu.memory_space<vmem>>, %arg5: memref<128x384xbf16, #tpu.memory_space<vmem>>, %arg6: memref<1x128xf32, #tpu.memory_space<vmem>>, %arg7: memref<1x128xf32, #tpu.memory_space<vmem>>, %arg8: memref<1x128xf32, #tpu.memory_space<vmem>>, %arg9: memref<128x8xf32, #tpu.memory_space<vmem>>, %arg10: memref<8x128xf32, #tpu.memory_space<vmem>>, %arg11: memref<2x16x128xf32, #tpu.memory_space<vmem>>, %arg12: memref<2x16x128xf32, #tpu.memory_space<vmem>>) attributes {dimension_semantics = [], scalar_prefetch = 0 : i64, scratch_operands = 1 : i64, tpu.core_type = #tpu.core_type<tc>} {
    %c0 = arith.constant 0 : index
    %c0_0 = arith.constant 0 : index
    %c0_1 = arith.constant 0 : index
    %0 = vector.load %arg0[%c0, %c0_0, %c0_1] : memref<2x16x64xf32, #tpu.memory_space<vmem>>, vector<2x16x64xf32>
    %1 = vector.shape_cast %0 : vector<2x16x64xf32> to vector<32x64xf32>
    %2 = arith.truncf %1 : vector<32x64xf32> to vector<32x64xbf16>
    %c0_2 = arith.constant 0 : index
    %c0_3 = arith.constant 0 : index
    %3 = vector.load %arg1[%c0_2, %c0_3] : memref<64x384xbf16, #tpu.memory_space<vmem>>, vector<64x384xbf16>
    %cst = arith.constant dense<0.000000e+00> : vector<32x384xf32>
    %4 = tpu.matmul %2, %3, %cst {dimension_numbers = #tpu.dot_dimension_numbers<[1], [0], [0], [1], [0, 0, 1, 1], [], []>} : vector<32x64xbf16>, vector<64x384xbf16>, vector<32x384xf32> -> vector<32x384xf32>
    %5 = vector.shape_cast %4 : vector<32x384xf32> to vector<2x16x384xf32>
    %6 = vector.extract_strided_slice %5 {offsets = [0, 0, 128], sizes = [2, 16, 128], strides = [1, 1, 1]} : vector<2x16x384xf32> to vector<2x16x128xf32>
    %c0_4 = arith.constant 0 : index
    %c0_5 = arith.constant 0 : index
    %c0_6 = arith.constant 0 : index
    %7 = vector.load %arg12[%c0_4, %c0_5, %c0_6] : memref<2x16x128xf32, #tpu.memory_space<vmem>>, vector<2x16x128xf32>
    tpu.vector_store %arg12[%c0_4, %c0_5, %c0_6], %6 {strides = array<i32>} : memref<2x16x128xf32, #tpu.memory_space<vmem>>, vector<2x16x128xf32>,
    %c0_7 = arith.constant 0 : index
    %c1 = arith.constant 1 : index
    %c0_8 = arith.constant 0 : index
    %8 = vector.load %arg12[%c0_7, %c1, %c0_8] : memref<2x16x128xf32, #tpu.memory_space<vmem>>, vector<2x15x128xf32>
    %9 = vector.extract_strided_slice %5 {offsets = [0, 0, 0], sizes = [2, 15, 128], strides = [1, 1, 1]} : vector<2x16x384xf32> to vector<2x15x128xf32>
    %10 = arith.addf %8, %9 : vector<2x15x128xf32>
    %c0_9 = arith.constant 0 : index
    %c1_10 = arith.constant 1 : index
    %c0_11 = arith.constant 0 : index
    %11 = vector.load %arg12[%c0_9, %c1_10, %c0_11] : memref<2x16x128xf32, #tpu.memory_space<vmem>>, vector<2x15x128xf32>
    tpu.vector_store %arg12[%c0_9, %c1_10, %c0_11], %10 {strides = array<i32>} : memref<2x16x128xf32, #tpu.memory_space<vmem>>, vector<2x15x128xf32>,
    %c0_12 = arith.constant 0 : index
    %c0_13 = arith.constant 0 : index
    %c0_14 = arith.constant 0 : index
    %12 = vector.load %arg12[%c0_12, %c0_13, %c0_14] : memref<2x16x128xf32, #tpu.memory_space<vmem>>, vector<2x15x128xf32>
    %13 = vector.extract_strided_slice %5 {offsets = [0, 1, 256], sizes = [2, 15, 128], strides = [1, 1, 1]} : vector<2x16x384xf32> to vector<2x15x128xf32>
    %14 = arith.addf %12, %13 : vector<2x15x128xf32>
    %c0_15 = arith.constant 0 : index
    %c0_16 = arith.constant 0 : index
    %c0_17 = arith.constant 0 : index
    %15 = vector.load %arg12[%c0_15, %c0_16, %c0_17] : memref<2x16x128xf32, #tpu.memory_space<vmem>>, vector<2x15x128xf32>
    tpu.vector_store %arg12[%c0_15, %c0_16, %c0_17], %14 {strides = array<i32>} : memref<2x16x128xf32, #tpu.memory_space<vmem>>, vector<2x15x128xf32>,
    %c0_18 = arith.constant 0 : index
    %c0_19 = arith.constant 0 : index
    %c0_20 = arith.constant 0 : index
    %16 = vector.load %arg12[%c0_18, %c0_19, %c0_20] : memref<2x16x128xf32, #tpu.memory_space<vmem>>, vector<2x16x128xf32>
    %17 = vector.shape_cast %16 : vector<2x16x128xf32> to vector<32x128xf32>
    %c0_21 = arith.constant 0 : index
    %c0_22 = arith.constant 0 : index
    %18 = vector.load %arg2[%c0_21, %c0_22] : memref<1x128xf32, #tpu.memory_space<vmem>>, vector<1x128xf32>
    %19 = vector.broadcast %18 : vector<1x128xf32> to vector<32x128xf32>
    %20 = arith.addf %17, %19 : vector<32x128xf32>
    %cst_23 = arith.constant dense<0.000000e+00> : vector<128xf32>
    %21 = vector.multi_reduction <add>, %20, %cst_23 [0] : vector<32x128xf32> to vector<128xf32>
    %22 = vector.shape_cast %21 : vector<128xf32> to vector<1x128xf32>
    %c0_24 = arith.constant 0 : index
    %c0_25 = arith.constant 0 : index
    %23 = vector.load %arg9[%c0_24, %c0_25] : memref<128x8xf32, #tpu.memory_space<vmem>>, vector<128x8xf32>
    %cst_26 = arith.constant dense<0.000000e+00> : vector<1x8xf32>
    %24 = tpu.matmul %22, %23, %cst_26 {dimension_numbers = #tpu.dot_dimension_numbers<[1], [0], [0], [1], [0, 0, 1, 1], [], []>} : vector<1x128xf32>, vector<128x8xf32>, vector<1x8xf32> -> vector<1x8xf32>
    %cst_27 = arith.constant 0.001953125 : f32
    %25 = vector.broadcast %cst_27 : f32 to vector<1x8xf32>
    %26 = arith.mulf %24, %25 : vector<1x8xf32>
    %c0_28 = arith.constant 0 : index
    %c0_29 = arith.constant 0 : index
    %27 = vector.load %arg10[%c0_28, %c0_29] : memref<8x128xf32, #tpu.memory_space<vmem>>, vector<8x128xf32>
    %cst_30 = arith.constant dense<0.000000e+00> : vector<1x128xf32>
    %28 = tpu.matmul %26, %27, %cst_30 {dimension_numbers = #tpu.dot_dimension_numbers<[1], [0], [0], [1], [0, 0, 1, 1], [], []>} : vector<1x8xf32>, vector<8x128xf32>, vector<1x128xf32> -> vector<1x128xf32>
    %29 = vector.broadcast %28 : vector<1x128xf32> to vector<32x128xf32>
    %30 = arith.subf %20, %29 : vector<32x128xf32>
    %31 = arith.mulf %30, %30 : vector<32x128xf32>
    %cst_31 = arith.constant dense<0.000000e+00> : vector<128xf32>
    %32 = vector.multi_reduction <add>, %31, %cst_31 [0] : vector<32x128xf32> to vector<128xf32>
    %33 = vector.shape_cast %32 : vector<128xf32> to vector<1x128xf32>
    %c0_32 = arith.constant 0 : index
    %c0_33 = arith.constant 0 : index
    %34 = vector.load %arg9[%c0_32, %c0_33] : memref<128x8xf32, #tpu.memory_space<vmem>>, vector<128x8xf32>
    %cst_34 = arith.constant dense<0.000000e+00> : vector<1x8xf32>
    %35 = tpu.matmul %33, %34, %cst_34 {dimension_numbers = #tpu.dot_dimension_numbers<[1], [0], [0], [1], [0, 0, 1, 1], [], []>} : vector<1x128xf32>, vector<128x8xf32>, vector<1x8xf32> -> vector<1x8xf32>
    %cst_35 = arith.constant 0.001953125 : f32
    %36 = vector.broadcast %cst_35 : f32 to vector<1x8xf32>
    %37 = arith.mulf %35, %36 : vector<1x8xf32>
    %c0_36 = arith.constant 0 : index
    %c0_37 = arith.constant 0 : index
    %38 = vector.load %arg10[%c0_36, %c0_37] : memref<8x128xf32, #tpu.memory_space<vmem>>, vector<8x128xf32>
    %cst_38 = arith.constant dense<0.000000e+00> : vector<1x128xf32>
    %39 = tpu.matmul %37, %38, %cst_38 {dimension_numbers = #tpu.dot_dimension_numbers<[1], [0], [0], [1], [0, 0, 1, 1], [], []>} : vector<1x8xf32>, vector<8x128xf32>, vector<1x128xf32> -> vector<1x128xf32>
    %cst_39 = arith.constant 9.99999974E-6 : f32
    %40 = vector.broadcast %cst_39 : f32 to vector<1x128xf32>
    %41 = arith.addf %39, %40 : vector<1x128xf32>
    %42 = math.rsqrt %41 : vector<1x128xf32>
    %43 = vector.broadcast %42 : vector<1x128xf32> to vector<32x128xf32>
    %44 = arith.mulf %30, %43 : vector<32x128xf32>
    %c0_40 = arith.constant 0 : index
    %c0_41 = arith.constant 0 : index
    %45 = vector.load %arg3[%c0_40, %c0_41] : memref<1x128xf32, #tpu.memory_space<vmem>>, vector<1x128xf32>
    %46 = vector.broadcast %45 : vector<1x128xf32> to vector<32x128xf32>
    %47 = arith.mulf %44, %46 : vector<32x128xf32>
    %c0_42 = arith.constant 0 : index
    %c0_43 = arith.constant 0 : index
    %48 = vector.load %arg4[%c0_42, %c0_43] : memref<1x128xf32, #tpu.memory_space<vmem>>, vector<1x128xf32>
    %49 = vector.broadcast %48 : vector<1x128xf32> to vector<32x128xf32>
    %50 = arith.addf %47, %49 : vector<32x128xf32>
    %cst_44 = arith.constant 0.000000e+00 : f32
    %51 = vector.broadcast %cst_44 : f32 to vector<32x128xf32>
    %52 = arith.maximumf %50, %51 : vector<32x128xf32>
    %53 = vector.shape_cast %52 : vector<32x128xf32> to vector<2x16x128xf32>
    %c0_45 = arith.constant 0 : index
    %c0_46 = arith.constant 0 : index
    %c0_47 = arith.constant 0 : index
    %54 = vector.load %arg12[%c0_45, %c0_46, %c0_47] : memref<2x16x128xf32, #tpu.memory_space<vmem>>, vector<2x16x128xf32>
    tpu.vector_store %arg12[%c0_45, %c0_46, %c0_47], %53 {strides = array<i32>} : memref<2x16x128xf32, #tpu.memory_space<vmem>>, vector<2x16x128xf32>,
    %c0_48 = arith.constant 0 : index
    %c0_49 = arith.constant 0 : index
    %c0_50 = arith.constant 0 : index
    %55 = vector.load %arg12[%c0_48, %c0_49, %c0_50] : memref<2x16x128xf32, #tpu.memory_space<vmem>>, vector<2x16x128xf32>
    %56 = vector.shape_cast %55 : vector<2x16x128xf32> to vector<32x128xf32>
    %57 = arith.truncf %56 : vector<32x128xf32> to vector<32x128xbf16>
    %c0_51 = arith.constant 0 : index
    %c0_52 = arith.constant 0 : index
    %58 = vector.load %arg5[%c0_51, %c0_52] : memref<128x384xbf16, #tpu.memory_space<vmem>>, vector<128x384xbf16>
    %cst_53 = arith.constant dense<0.000000e+00> : vector<32x384xf32>
    %59 = tpu.matmul %57, %58, %cst_53 {dimension_numbers = #tpu.dot_dimension_numbers<[1], [0], [0], [1], [0, 0, 1, 1], [], []>} : vector<32x128xbf16>, vector<128x384xbf16>, vector<32x384xf32> -> vector<32x384xf32>
    %60 = vector.shape_cast %59 : vector<32x384xf32> to vector<2x16x384xf32>
    %61 = vector.extract_strided_slice %60 {offsets = [0, 0, 128], sizes = [2, 16, 128], strides = [1, 1, 1]} : vector<2x16x384xf32> to vector<2x16x128xf32>
    %c0_54 = arith.constant 0 : index
    %c0_55 = arith.constant 0 : index
    %c0_56 = arith.constant 0 : index
    %62 = vector.load %arg11[%c0_54, %c0_55, %c0_56] : memref<2x16x128xf32, #tpu.memory_space<vmem>>, vector<2x16x128xf32>
    tpu.vector_store %arg11[%c0_54, %c0_55, %c0_56], %61 {strides = array<i32>} : memref<2x16x128xf32, #tpu.memory_space<vmem>>, vector<2x16x128xf32>,
    %c0_57 = arith.constant 0 : index
    %c1_58 = arith.constant 1 : index
    %c0_59 = arith.constant 0 : index
    %63 = vector.load %arg11[%c0_57, %c1_58, %c0_59] : memref<2x16x128xf32, #tpu.memory_space<vmem>>, vector<2x15x128xf32>
    %64 = vector.extract_strided_slice %60 {offsets = [0, 0, 0], sizes = [2, 15, 128], strides = [1, 1, 1]} : vector<2x16x384xf32> to vector<2x15x128xf32>
    %65 = arith.addf %63, %64 : vector<2x15x128xf32>
    %c0_60 = arith.constant 0 : index
    %c1_61 = arith.constant 1 : index
    %c0_62 = arith.constant 0 : index
    %66 = vector.load %arg11[%c0_60, %c1_61, %c0_62] : memref<2x16x128xf32, #tpu.memory_space<vmem>>, vector<2x15x128xf32>
    tpu.vector_store %arg11[%c0_60, %c1_61, %c0_62], %65 {strides = array<i32>} : memref<2x16x128xf32, #tpu.memory_space<vmem>>, vector<2x15x128xf32>,
    %c0_63 = arith.constant 0 : index
    %c0_64 = arith.constant 0 : index
    %c0_65 = arith.constant 0 : index
    %67 = vector.load %arg11[%c0_63, %c0_64, %c0_65] : memref<2x16x128xf32, #tpu.memory_space<vmem>>, vector<2x15x128xf32>
    %68 = vector.extract_strided_slice %60 {offsets = [0, 1, 256], sizes = [2, 15, 128], strides = [1, 1, 1]} : vector<2x16x384xf32> to vector<2x15x128xf32>
    %69 = arith.addf %67, %68 : vector<2x15x128xf32>
    %c0_66 = arith.constant 0 : index
    %c0_67 = arith.constant 0 : index
    %c0_68 = arith.constant 0 : index
    %70 = vector.load %arg11[%c0_66, %c0_67, %c0_68] : memref<2x16x128xf32, #tpu.memory_space<vmem>>, vector<2x15x128xf32>
    tpu.vector_store %arg11[%c0_66, %c0_67, %c0_68], %69 {strides = array<i32>} : memref<2x16x128xf32, #tpu.memory_space<vmem>>, vector<2x15x128xf32>,
    %c0_69 = arith.constant 0 : index
    %c0_70 = arith.constant 0 : index
    %c0_71 = arith.constant 0 : index
    %71 = vector.load %arg11[%c0_69, %c0_70, %c0_71] : memref<2x16x128xf32, #tpu.memory_space<vmem>>, vector<2x16x128xf32>
    %72 = vector.shape_cast %71 : vector<2x16x128xf32> to vector<32x128xf32>
    %c0_72 = arith.constant 0 : index
    %c0_73 = arith.constant 0 : index
    %73 = vector.load %arg6[%c0_72, %c0_73] : memref<1x128xf32, #tpu.memory_space<vmem>>, vector<1x128xf32>
    %74 = vector.broadcast %73 : vector<1x128xf32> to vector<32x128xf32>
    %75 = arith.addf %72, %74 : vector<32x128xf32>
    %cst_74 = arith.constant dense<0.000000e+00> : vector<128xf32>
    %76 = vector.multi_reduction <add>, %75, %cst_74 [0] : vector<32x128xf32> to vector<128xf32>
    %77 = vector.shape_cast %76 : vector<128xf32> to vector<1x128xf32>
    %c0_75 = arith.constant 0 : index
    %c0_76 = arith.constant 0 : index
    %78 = vector.load %arg9[%c0_75, %c0_76] : memref<128x8xf32, #tpu.memory_space<vmem>>, vector<128x8xf32>
    %cst_77 = arith.constant dense<0.000000e+00> : vector<1x8xf32>
    %79 = tpu.matmul %77, %78, %cst_77 {dimension_numbers = #tpu.dot_dimension_numbers<[1], [0], [0], [1], [0, 0, 1, 1], [], []>} : vector<1x128xf32>, vector<128x8xf32>, vector<1x8xf32> -> vector<1x8xf32>
    %cst_78 = arith.constant 0.001953125 : f32
    %80 = vector.broadcast %cst_78 : f32 to vector<1x8xf32>
    %81 = arith.mulf %79, %80 : vector<1x8xf32>
    %c0_79 = arith.constant 0 : index
    %c0_80 = arith.constant 0 : index
    %82 = vector.load %arg10[%c0_79, %c0_80] : memref<8x128xf32, #tpu.memory_space<vmem>>, vector<8x128xf32>
    %cst_81 = arith.constant dense<0.000000e+00> : vector<1x128xf32>
    %83 = tpu.matmul %81, %82, %cst_81 {dimension_numbers = #tpu.dot_dimension_numbers<[1], [0], [0], [1], [0, 0, 1, 1], [], []>} : vector<1x8xf32>, vector<8x128xf32>, vector<1x128xf32> -> vector<1x128xf32>
    %84 = vector.broadcast %83 : vector<1x128xf32> to vector<32x128xf32>
    %85 = arith.subf %75, %84 : vector<32x128xf32>
    %86 = arith.mulf %85, %85 : vector<32x128xf32>
    %cst_82 = arith.constant dense<0.000000e+00> : vector<128xf32>
    %87 = vector.multi_reduction <add>, %86, %cst_82 [0] : vector<32x128xf32> to vector<128xf32>
    %88 = vector.shape_cast %87 : vector<128xf32> to vector<1x128xf32>
    %c0_83 = arith.constant 0 : index
    %c0_84 = arith.constant 0 : index
    %89 = vector.load %arg9[%c0_83, %c0_84] : memref<128x8xf32, #tpu.memory_space<vmem>>, vector<128x8xf32>
    %cst_85 = arith.constant dense<0.000000e+00> : vector<1x8xf32>
    %90 = tpu.matmul %88, %89, %cst_85 {dimension_numbers = #tpu.dot_dimension_numbers<[1], [0], [0], [1], [0, 0, 1, 1], [], []>} : vector<1x128xf32>, vector<128x8xf32>, vector<1x8xf32> -> vector<1x8xf32>
    %cst_86 = arith.constant 0.001953125 : f32
    %91 = vector.broadcast %cst_86 : f32 to vector<1x8xf32>
    %92 = arith.mulf %90, %91 : vector<1x8xf32>
    %c0_87 = arith.constant 0 : index
    %c0_88 = arith.constant 0 : index
    %93 = vector.load %arg10[%c0_87, %c0_88] : memref<8x128xf32, #tpu.memory_space<vmem>>, vector<8x128xf32>
    %cst_89 = arith.constant dense<0.000000e+00> : vector<1x128xf32>
    %94 = tpu.matmul %92, %93, %cst_89 {dimension_numbers = #tpu.dot_dimension_numbers<[1], [0], [0], [1], [0, 0, 1, 1], [], []>} : vector<1x8xf32>, vector<8x128xf32>, vector<1x128xf32> -> vector<1x128xf32>
    %cst_90 = arith.constant 9.99999974E-6 : f32
    %95 = vector.broadcast %cst_90 : f32 to vector<1x128xf32>
    %96 = arith.addf %94, %95 : vector<1x128xf32>
    %97 = math.rsqrt %96 : vector<1x128xf32>
    %98 = vector.broadcast %97 : vector<1x128xf32> to vector<32x128xf32>
    %99 = arith.mulf %85, %98 : vector<32x128xf32>
    %c0_91 = arith.constant 0 : index
    %c0_92 = arith.constant 0 : index
    %100 = vector.load %arg7[%c0_91, %c0_92] : memref<1x128xf32, #tpu.memory_space<vmem>>, vector<1x128xf32>
    %101 = vector.broadcast %100 : vector<1x128xf32> to vector<32x128xf32>
    %102 = arith.mulf %99, %101 : vector<32x128xf32>
    %c0_93 = arith.constant 0 : index
    %c0_94 = arith.constant 0 : index
    %103 = vector.load %arg8[%c0_93, %c0_94] : memref<1x128xf32, #tpu.memory_space<vmem>>, vector<1x128xf32>
    %104 = vector.broadcast %103 : vector<1x128xf32> to vector<32x128xf32>
    %105 = arith.addf %102, %104 : vector<32x128xf32>
    %cst_95 = arith.constant 0.000000e+00 : f32
    %106 = vector.broadcast %cst_95 : f32 to vector<32x128xf32>
    %107 = arith.maximumf %105, %106 : vector<32x128xf32>
    %108 = vector.shape_cast %107 : vector<32x128xf32> to vector<2x16x128xf32>
    %c0_96 = arith.constant 0 : index
    %c0_97 = arith.constant 0 : index
    %c0_98 = arith.constant 0 : index
    %109 = vector.load %arg11[%c0_96, %c0_97, %c0_98] : memref<2x16x128xf32, #tpu.memory_space<vmem>>, vector<2x16x128xf32>
    tpu.vector_store %arg11[%c0_96, %c0_97, %c0_98], %108 {strides = array<i32>} : memref<2x16x128xf32, #tpu.memory_space<vmem>>, vector<2x16x128xf32>,
    return
  }
}

</mosaic_0001>

<bundles_post_ra>
// kernel: tile.39
= control target key start
LH: loop header
LB: loop body
LE: loop exit
PB: predicated region body
PF: predicated region fallthrough
CT: control target
= control target key end

     0   :  { %vm6_vm0 = vcmask 1043458   ;;  %vm10_vm1 = vcmask 1045508   ;;  %vm14_vm2 = vcmask 1047558   ;;  %s19_s6 = smov 3  ;;  %s22_s7 = smov 12  ;;  %vm16_vm3 = vcmask 64512   ;;  %s736_s0 = inlined_call_operand.vmem [shape: f32[16,8,8], index: 0, kind: input, shape index: {}]   ;;  %s737_s1 = inlined_call_operand.vmem [shape: f32[128,8], index: 1, kind: output, shape index: {}]  }
   0x1   :  { %v348_v0 = vld [vmem:[%s736_s0 + $0xf] ss:$16 sm:%s19_s6]   ;;  %s27_s12 = smov 48  ;;  %s32_s13 = smov 192  ;;  %vm38_vm4 = vcmask 1048512   ;;  %vm60_vm5 = vcmask 982912  }
   0x2   :  { %v349_v1 = vld [vmem:[%s736_s0 + $0xf] ss:$16 sm:%s22_s7]   ;;  %s63_s18 = smov 3  ;;  %s66_s21 = smov 12  ;;  %vm82_vm6 = vcmask 917312   ;;  %vm104_vm7 = vcmask 851712  }
   0x3   :  { %v25_v2 = vsel %vm6_vm0, %v349_v1, %v348_v0  ;;  %v350_v3 = vld [vmem:[%s736_s0 + $0xf] ss:$16 sm:%s27_s12]   ;;  %v356_v6 = vld [vmem:[%s736_s0 + $0xd] ss:$16 sm:%s63_s18]   ;;  %s71_s22 = smov 48  ;;  %s76_s27 = smov 192 }
   0x4   :  { %v351_v4 = vld [vmem:[%s736_s0 + $0xf] ss:$16 sm:%s32_s13]   ;;  %v30_v5 = vsel %vm10_vm1, %v350_v3, %v25_v2  ;;  %v357_v8 = vld [vmem:[%s736_s0 + $0xd] ss:$16 sm:%s66_s21]   ;;  %s423_s28 = smov 120   ;;  %s41_s2 = smov 3 }
   0x5   :  { %v35_v7 = vsel %vm14_vm2, %v351_v4, %v30_v5  ;;  %v358_v9 = vld [vmem:[%s736_s0 + $0xd] ss:$16 sm:%s71_s22]   ;;  %v69_v10 = vsel %vm6_vm0, %v357_v8, %v356_v6  ;;  %s44_s3 = smov 12  ;;  %v352_v13 = vld [vmem:[%s736_s0 + $0xe] ss:$16 sm:%s41_s2]   ;;  %s49_s8 = smov 48 }
   0x6   :  { %36 = vrot.lane.b32.xlu0 %v35_v7, %s423_s28  ;;  %v359_v11 = vld [vmem:[%s736_s0 + $0xd] ss:$16 sm:%s76_s27]   ;;  %v74_v12 = vsel %vm10_vm1, %v358_v9, %v69_v10  ;;  %s54_s9 = smov 192  ;;  %s85_s14 = smov 3  ;;  %vm126_vm8 = vcmask 786112   ;;  %vm148_vm9 = vcmask 720512  }
   0x7   :  { %v353_v14 = vld [vmem:[%s736_s0 + $0xe] ss:$16 sm:%s44_s3]   ;;  %v79_v15 = vsel %vm14_vm2, %v359_v11, %v74_v12  ;;  %s424_s15 = smov 104   ;;  %v360_v20 = vld [vmem:[%s736_s0 + $0xc] ss:$16 sm:%s85_s14]   ;;  %s88_s18 = smov 12 }
   0x8   :  { %v47_v16 = vsel %vm6_vm0, %v353_v14, %v352_v13  ;;  %v354_v17 = vld [vmem:[%s736_s0 + $0xe] ss:$16 sm:%s49_s8]   ;;  %80 = vrot.lane.b32.xlu1 %v79_v15, %s424_s15  ;;  %s93_s19 = smov 48  ;;  %s98_s24 = smov 192  ;;  %vm170_vm10 = vcmask 654912   ;;  %vm192_vm11 = vcmask 589312  }
   0x9   :  { %v355_v18 = vld [vmem:[%s736_s0 + $0xe] ss:$16 sm:%s54_s9]   ;;  %v52_v19 = vsel %vm10_vm1, %v354_v17, %v47_v16  ;;  %v361_v22 = vld [vmem:[%s736_s0 + $0xc] ss:$16 sm:%s88_s18]   ;;  %s425_s25 = smov 112   ;;  %s107_s28 = smov 3 }
   0xa   :  { %v57_v21 = vsel %vm14_vm2, %v355_v18, %v52_v19  ;;  %v362_v23 = vld [vmem:[%s736_s0 + $0xc] ss:$16 sm:%s93_s19]   ;;  %v91_v24 = vsel %vm6_vm0, %v361_v22, %v360_v20  ;;  %s110_s29 = smov 12  ;;  %v364_v27 = vld [vmem:[%s736_s0 + $0xb] ss:$16 sm:%s107_s28]   ;;  %s115_s5 = smov 48 }
   0xb   :  { %58 = vrot.lane.b32.xlu0 %v57_v21, %s425_s25  ;;  %v363_v25 = vld [vmem:[%s736_s0 + $0xc] ss:$16 sm:%s98_s24]   ;;  %v96_v26 = vsel %vm10_vm1, %v362_v23, %v91_v24  ;;  %s120_s6 = smov 192  ;;  %s129_s11 = smov 3  ;;  %vm214_vm12 = vcmask 523712   ;;  %vm236_vm13 = vcmask 458112  }
   0xc   :  { %v365_v28 = vld [vmem:[%s736_s0 + $0xb] ss:$16 sm:%s110_s29]   ;;  %v101_v29 = vsel %vm14_vm2, %v363_v25, %v96_v26  ;;  %s426_s12 = smov 96   ;;  %v368_v34 = vld [vmem:[%s736_s0 + $0xa] ss:$16 sm:%s129_s11]   ;;  %s132_s15 = smov 12 }
   0xd   :  { %v113_v30 = vsel %vm6_vm0, %v365_v28, %v364_v27  ;;  %v366_v31 = vld [vmem:[%s736_s0 + $0xb] ss:$16 sm:%s115_s5]   ;;  %102 = vrot.lane.b32.xlu1 %v101_v29, %s426_s12  ;;  %s137_s16 = smov 48  ;;  %s142_s21 = smov 192  ;;  %vm258_vm14 = vcmask 392512   ;;  %vm280_vm15 = vcmask 326912  }
   0xe   :  { %v367_v32 = vld [vmem:[%s736_s0 + $0xb] ss:$16 sm:%s120_s6]   ;;  %v118_v33 = vsel %vm10_vm1, %v366_v31, %v113_v30  ;;  %v369_v36 = vld [vmem:[%s736_s0 + $0xa] ss:$16 sm:%s132_s15]   ;;  %s427_s22 = smov 88   ;;  %s151_s25 = smov 3 }
   0xf   :  { %v123_v35 = vsel %vm14_vm2, %v367_v32, %v118_v33  ;;  %v370_v37 = vld [vmem:[%s736_s0 + $0xa] ss:$16 sm:%s137_s16]   ;;  %v135_v38 = vsel %vm6_vm0, %v369_v36, %v368_v34  ;;  %s154_s26 = smov 12  ;;  %v372_v41 = vld [vmem:[%s736_s0 + $0x9] ss:$16 sm:%s151_s25]   ;;  %s159_s2 = smov 48 }
  0x10   :  { %124 = vrot.lane.b32.xlu0 %v123_v35, %s427_s22  ;;  %v371_v39 = vld [vmem:[%s736_s0 + $0xa] ss:$16 sm:%s142_s21]   ;;  %v140_v40 = vsel %vm10_vm1, %v370_v37, %v135_v38  ;;  %s164_s3 = smov 192  ;;  %s173_s8 = smov 3 }
  0x11   :  { %v373_v42 = vld [vmem:[%s736_s0 + $0x9] ss:$16 sm:%s154_s26]   ;;  %v145_v43 = vsel %vm14_vm2, %v371_v39, %v140_v40  ;;  %s428_s9 = smov 80   ;;  %v376_v48 = vld [vmem:[%s736_s0 + $0x8] ss:$16 sm:%s173_s8]   ;;  %s176_s12 = smov 12 }
  0x12   :  { %v157_v44 = vsel %vm6_vm0, %v373_v42, %v372_v41  ;;  %v374_v45 = vld [vmem:[%s736_s0 + $0x9] ss:$16 sm:%s159_s2]   ;;  %146 = vrot.lane.b32.xlu1 %v145_v43, %s428_s9  ;;  %s181_s13 = smov 48  ;;  %s186_s18 = smov 192 }
  0x13   :  { %v375_v46 = vld [vmem:[%s736_s0 + $0x9] ss:$16 sm:%s164_s3]   ;;  %v162_v47 = vsel %vm10_vm1, %v374_v45, %v157_v44  ;;  %v377_v50 = vld [vmem:[%s736_s0 + $0x8] ss:$16 sm:%s176_s12]   ;;  %s429_s19 = smov 72   ;;  %s195_s22 = smov 3 }
  0x14   :  { %v167_v49 = vsel %vm14_vm2, %v375_v46, %v162_v47  ;;  %v378_v51 = vld [vmem:[%s736_s0 + $0x8] ss:$16 sm:%s181_s13]   ;;  %v179_v52 = vsel %vm6_vm0, %v377_v50, %v376_v48  ;;  %s198_s23 = smov 12  ;;  %v380_v55 = vld [vmem:[%s736_s0 + $0x7] ss:$16 sm:%s195_s22]   ;;  %s203_s28 = smov 48 }
  0x15   :  { %168 = vrot.lane.b32.xlu0 %v167_v49, %s429_s19  ;;  %v379_v53 = vld [vmem:[%s736_s0 + $0x8] ss:$16 sm:%s186_s18]   ;;  %v184_v54 = vsel %vm10_vm1, %v378_v51, %v179_v52  ;;  %s208_s29 = smov 192  ;;  %s217_s5 = smov 3 }
  0x16   :  { %v381_v56 = vld [vmem:[%s736_s0 + $0x7] ss:$16 sm:%s198_s23]   ;;  %v189_v57 = vsel %vm14_vm2, %v379_v53, %v184_v54  ;;  %s430_s6 = smov 64   ;;  %v384_v62 = vld [vmem:[%s736_s0 + $0x6] ss:$16 sm:%s217_s5]   ;;  %s220_s9 = smov 12 }
  0x17   :  { %v201_v58 = vsel %vm6_vm0, %v381_v56, %v380_v55  ;;  %v382_v59 = vld [vmem:[%s736_s0 + $0x7] ss:$16 sm:%s203_s28]   ;;  %190 = vrot.lane.b32.xlu1 %v189_v57, %s430_s6  ;;  %s225_s10 = smov 48  ;;  %s230_s15 = smov 192 }
  0x18   :  { %v383_v60 = vld [vmem:[%s736_s0 + $0x7] ss:$16 sm:%s208_s29]   ;;  %v206_v61 = vsel %vm10_vm1, %v382_v59, %v201_v58  ;;  %v385_v0 = vld [vmem:[%s736_s0 + $0x6] ss:$16 sm:%s220_s9]   ;;  %s431_s16 = smov 56   ;;  %s239_s19 = smov 3 }
  0x19   :  { %v211_v63 = vsel %vm14_vm2, %v383_v60, %v206_v61  ;;  %v386_v1 = vld [vmem:[%s736_s0 + $0x6] ss:$16 sm:%s225_s10]   ;;  %v223_v2 = vsel %vm6_vm0, %v385_v0, %v384_v62  ;;  %s242_s20 = smov 12  ;;  %v388_v5 = vld [vmem:[%s736_s0 + $0x5] ss:$16 sm:%s239_s19]   ;;  %s247_s25 = smov 48 }
  0x1a   :  { %212 = vrot.lane.b32.xlu0 %v211_v63, %s431_s16  ;;  %v387_v3 = vld [vmem:[%s736_s0 + $0x6] ss:$16 sm:%s230_s15]   ;;  %v228_v4 = vsel %vm10_vm1, %v386_v1, %v223_v2  ;;  %s252_s26 = smov 192  ;;  %s261_s2 = smov 3 }
  0x1b   :  { %v389_v6 = vld [vmem:[%s736_s0 + $0x5] ss:$16 sm:%s242_s20]   ;;  %v233_v7 = vsel %vm14_vm2, %v387_v3, %v228_v4  ;;  %s432_s3 = smov 48   ;;  %v392_v12 = vld [vmem:[%s736_s0 + $0x4] ss:$16 sm:%s261_s2]   ;;  %s264_s6 = smov 12 }
  0x1c   :  { %v245_v8 = vsel %vm6_vm0, %v389_v6, %v388_v5  ;;  %v390_v9 = vld [vmem:[%s736_s0 + $0x5] ss:$16 sm:%s247_s25]   ;;  %234 = vrot.lane.b32.xlu1 %v233_v7, %s432_s3  ;;  %s269_s7 = smov 48  ;;  %s274_s12 = smov 192 }
  0x1d   :  { %v391_v10 = vld [vmem:[%s736_s0 + $0x5] ss:$16 sm:%s252_s26]   ;;  %v250_v11 = vsel %vm10_vm1, %v390_v9, %v245_v8  ;;  %v393_v14 = vld [vmem:[%s736_s0 + $0x4] ss:$16 sm:%s264_s6]   ;;  %s433_s13 = smov 40   ;;  %s283_s16 = smov 3 }
  0x1e   :  { %v255_v13 = vsel %vm14_vm2, %v391_v10, %v250_v11  ;;  %v394_v15 = vld [vmem:[%s736_s0 + $0x4] ss:$16 sm:%s269_s7]   ;;  %v267_v16 = vsel %vm6_vm0, %v393_v14, %v392_v12  ;;  %s286_s17 = smov 12  ;;  %v396_v19 = vld [vmem:[%s736_s0 + $0x3] ss:$16 sm:%s283_s16]   ;;  %s291_s22 = smov 48 }
  0x1f   :  { %256 = vrot.lane.b32.xlu0 %v255_v13, %s433_s13  ;;  %v395_v17 = vld [vmem:[%s736_s0 + $0x4] ss:$16 sm:%s274_s12]   ;;  %v272_v18 = vsel %vm10_vm1, %v394_v15, %v267_v16  ;;  %s296_s23 = smov 192  ;;  %s305_s28 = smov 3 }
  0x20   :  { %v397_v20 = vld [vmem:[%s736_s0 + $0x3] ss:$16 sm:%s286_s17]   ;;  %v277_v21 = vsel %vm14_vm2, %v395_v17, %v272_v18  ;;  %s434_s29 = smov 32   ;;  %v400_v26 = vld [vmem:[%s736_s0 + $0x2] ss:$16 sm:%s305_s28]   ;;  %s308_s3 = smov 12 }
  0x21   :  { %v289_v22 = vsel %vm6_vm0, %v397_v20, %v396_v19  ;;  %v398_v23 = vld [vmem:[%s736_s0 + $0x3] ss:$16 sm:%s291_s22]   ;;  %278 = vrot.lane.b32.xlu1 %v277_v21, %s434_s29  ;;  %s313_s4 = smov 48  ;;  %s318_s9 = smov 192 }
  0x22   :  { %v399_v24 = vld [vmem:[%s736_s0 + $0x3] ss:$16 sm:%s296_s23]   ;;  %v294_v25 = vsel %vm10_vm1, %v398_v23, %v289_v22  ;;  %v401_v28 = vld [vmem:[%s736_s0 + $0x2] ss:$16 sm:%s308_s3]   ;;  %s435_s10 = smov 24   ;;  %s327_s13 = smov 3 }
  0x23   :  { %v299_v27 = vsel %vm14_vm2, %v399_v24, %v294_v25  ;;  %v402_v29 = vld [vmem:[%s736_s0 + $0x2] ss:$16 sm:%s313_s4]   ;;  %v311_v30 = vsel %vm6_vm0, %v401_v28, %v400_v26  ;;  %s330_s14 = smov 12  ;;  %v404_v33 = vld [vmem:[%s736_s0 + $0x1] ss:$16 sm:%s327_s13]   ;;  %s335_s19 = smov 48 }
  0x24   :  { %300 = vrot.lane.b32.xlu0 %v299_v27, %s435_s10  ;;  %v403_v31 = vld [vmem:[%s736_s0 + $0x2] ss:$16 sm:%s318_s9]   ;;  %v316_v32 = vsel %vm10_vm1, %v402_v29, %v311_v30  ;;  %s340_s20 = smov 192  ;;  %s2_s25 = smov 3 }
  0x25   :  { %v405_v34 = vld [vmem:[%s736_s0 + $0x1] ss:$16 sm:%s330_s14]   ;;  %v321_v35 = vsel %vm14_vm2, %v403_v31, %v316_v32  ;;  %s436_s26 = smov 16   ;;  %s4_s27 = smov 12  ;;  %v3_v40 = vld [vmem:[%s736_s0] ss:$16 sm:%s2_s25]  }
  0x26   :  { %v333_v36 = vsel %vm6_vm0, %v405_v34, %v404_v33  ;;  %v406_v37 = vld [vmem:[%s736_s0 + $0x1] ss:$16 sm:%s335_s19]   ;;  %322 = vrot.lane.b32.xlu1 %v321_v35, %s436_s26  ;;  %s8_s28 = smov 48  ;;  %s12_s2 = smov 192 }
  0x27   :  { %v407_v38 = vld [vmem:[%s736_s0 + $0x1] ss:$16 sm:%s340_s20]   ;;  %v338_v39 = vsel %vm10_vm1, %v406_v37, %v333_v36  ;;  %v5_v42 = vld [vmem:[%s736_s0] ss:$16 sm:%s4_s27]   ;;  %s437_s7 = smov 8  }
  0x28   :  { %v343_v41 = vsel %vm14_vm2, %v407_v38, %v338_v39  ;;  %v9_v43 = vld [vmem:[%s736_s0] ss:$16 sm:%s8_s28]   ;;  %v7_v44 = vsel %vm6_vm0, %v5_v42, %v3_v40  ;;  %vm302_vm0 = vcmask 261312  }
  0x29   :  { %344 = vrot.lane.b32.xlu0 %v343_v41, %s437_s7  ;;  %v13_v45 = vld [vmem:[%s736_s0] ss:$16 sm:%s12_s2]   ;;  %v11_v46 = vsel %vm10_vm1, %v9_v43, %v7_v44  ;;  %vm324_vm1 = vcmask 195712  }
  0x2a   :  { %v15_v47 = vsel %vm14_vm2, %v13_v45, %v11_v46  ;;  %vm346_vm2 = vcmask 130112  }
  0x2b   :  { %17 = vst.msk [vmem:[%s737_s1] sm:$0xff] %vm16_vm3, %v15_v47  }
  0x78   :  { %v37_v48 = vpop.permute.xlu0 %36  }
  0x79   :  { %39 = vst.msk [vmem:[%s737_s1] sm:$0xff] %vm38_vm4, %v37_v48  }
  0x7a   :  { %v81_v49 = vpop.permute.xlu1 %80  }
  0x7d   :  { %v59_v50 = vpop.permute.xlu0 %58  }
  0x7e   :  { %61 = vst.msk [vmem:[%s737_s1] sm:$0xff] %vm60_vm5, %v59_v50  }
  0x7f   :  { %83 = vst.msk [vmem:[%s737_s1] sm:$0xff] %vm82_vm6, %v81_v49   ;;  %v103_v51 = vpop.permute.xlu1 %102  }
  0x80   :  { %105 = vst.msk [vmem:[%s737_s1] sm:$0xff] %vm104_vm7, %v103_v51  }
  0x82   :  { %v125_v52 = vpop.permute.xlu0 %124  }
  0x83   :  { %127 = vst.msk [vmem:[%s737_s1] sm:$0xff] %vm126_vm8, %v125_v52  }
  0x84   :  { %v147_v53 = vpop.permute.xlu1 %146  }
  0x85   :  { %149 = vst.msk [vmem:[%s737_s1] sm:$0xff] %vm148_vm9, %v147_v53  }
  0x87   :  { %v169_v54 = vpop.permute.xlu0 %168  }
  0x88   :  { %171 = vst.msk [vmem:[%s737_s1] sm:$0xff] %vm170_vm10, %v169_v54  }
  0x89   :  { %v191_v55 = vpop.permute.xlu1 %190  }
  0x8a   :  { %193 = vst.msk [vmem:[%s737_s1] sm:$0xff] %vm192_vm11, %v191_v55  }
  0x8c   :  { %v213_v56 = vpop.permute.xlu0 %212  }
  0x8d   :  { %215 = vst.msk [vmem:[%s737_s1] sm:$0xff] %vm214_vm12, %v213_v56  }
  0x8e   :  { %v235_v57 = vpop.permute.xlu1 %234  }
  0x8f   :  { %237 = vst.msk [vmem:[%s737_s1] sm:$0xff] %vm236_vm13, %v235_v57  }
  0x91   :  { %v257_v58 = vpop.permute.xlu0 %256  }
  0x92   :  { %259 = vst.msk [vmem:[%s737_s1] sm:$0xff] %vm258_vm14, %v257_v58  }
  0x93   :  { %v279_v59 = vpop.permute.xlu1 %278  }
  0x94   :  { %281 = vst.msk [vmem:[%s737_s1] sm:$0xff] %vm280_vm15, %v279_v59  }
  0x96   :  { %v301_v60 = vpop.permute.xlu0 %300  }
  0x97   :  { %303 = vst.msk [vmem:[%s737_s1] sm:$0xff] %vm302_vm0, %v301_v60  }
  0x98   :  { %v323_v61 = vpop.permute.xlu1 %322  }
  0x99   :  { %325 = vst.msk [vmem:[%s737_s1] sm:$0xff] %vm324_vm1, %v323_v61  }
  0x9b   :  { %v345_v62 = vpop.permute.xlu0 %344  }
  0x9c   :  { %347 = vst.msk [vmem:[%s737_s1] sm:$0xff] %vm346_vm2, %v345_v62  }

// kernel: tile.43
= control target key start
LH: loop header
LB: loop body
LE: loop exit
PB: predicated region body
PF: predicated region fallthrough
CT: control target
= control target key end

     0   :  { %s28_s0 = inlined_call_operand.vmem [shape: f32[8], index: 0, kind: input, shape index: {}]   ;;  %s29_s1 = inlined_call_operand.vmem [shape: f32[16,8], index: 1, kind: output, shape index: {}]  }
   0x1   :  { %v4_v0 = vld [vmem:[%s28_s0] ss:$0 sm:$0xff] }
   0x2   :  { %5 = vst [vmem:[%s29_s1] sm:$0xff] %v4_v0  ;;  %8 = vst [vmem:[%s29_s1 + $0x8] sm:$0xff] %v4_v0 }

// kernel: tile.44
= control target key start
LH: loop header
LB: loop body
LE: loop exit
PB: predicated region body
PF: predicated region fallthrough
CT: control target
= control target key end

     0   :  { %s131_s10 = smov 120   ;;  %s132_s11 = smov 104   ;;  %vm3_vm0 = vcmask 64512   ;;  %vm9_vm1 = vcmask 1048512   ;;  %vm15_vm2 = vcmask 982912   ;;  %vm21_vm3 = vcmask 917312   ;;  %s207_s0 = inlined_call_operand.vmem [shape: f32[16,8], index: 0, kind: input, shape index: {}]   ;;  %s208_s1 = inlined_call_operand.vmem [shape: f32[1,128], index: 1, kind: output, shape index: {}]  }
   0x1   :  { %v101_v0 = vld [vmem:[%s207_s0 + $0xf] sm:$0x1]   ;;  %v103_v1 = vld [vmem:[%s207_s0 + $0xd] sm:$0x1]   ;;  %v102_v2 = vld [vmem:[%s207_s0 + $0xe] sm:$0x1]  }
   0x2   :  { %7 = vrot.lane.b32.xlu0 %v101_v0, %s131_s10  ;;  %19 = vrot.lane.b32.xlu1 %v103_v1, %s132_s11  ;;  %v104_v3 = vld [vmem:[%s207_s0 + $0xc] sm:$0x1]   ;;  %s133_s16 = smov 112   ;;  %s134_s17 = smov 96   ;;  %v105_v4 = vld [vmem:[%s207_s0 + $0xb] sm:$0x1]  }
   0x3   :  { %v106_v5 = vld [vmem:[%s207_s0 + $0xa] sm:$0x1]   ;;  %v2_v6 = vld [vmem:[%s207_s0] sm:$0x1]   ;;  %s135_s24 = smov 88   ;;  %s136_s25 = smov 80  }
   0x4   :  { %4 = vst.msk [vmem:[#allocation0] sm:$0x1] %vm3_vm0, %v2_v6   ;;  %v107_v7 = vld [vmem:[%s207_s0 + $0x9] sm:$0x1]   ;;  %v108_v8 = vld [vmem:[%s207_s0 + $0x8] sm:$0x1]  }
   0x5   :  { %s137_s30 = smov 72   ;;  %s138_s2 = smov 64   ;;  %v109_v9 = vld [vmem:[%s207_s0 + $0x7] sm:$0x1]   ;;  %v110_v10 = vld [vmem:[%s207_s0 + $0x6] sm:$0x1]  }
   0x6   :  { %13 = vrot.lane.b32.xlu0 %v102_v2, %s133_s16  ;;  %25 = vrot.lane.b32.xlu1 %v104_v3, %s134_s17  ;;  %s139_s7 = smov 56   ;;  %s140_s8 = smov 48   ;;  %v111_v11 = vld [vmem:[%s207_s0 + $0x5] sm:$0x1]   ;;  %v112_v12 = vld [vmem:[%s207_s0 + $0x4] sm:$0x1]  }
   0x7   :  { %s141_s13 = smov 40   ;;  %s142_s14 = smov 32   ;;  %v113_v13 = vld [vmem:[%s207_s0 + $0x3] sm:$0x1]   ;;  %v114_v14 = vld [vmem:[%s207_s0 + $0x2] sm:$0x1]  }
   0x8   :  { %s143_s19 = smov 24   ;;  %s144_s20 = smov 16   ;;  %v115_v15 = vld [vmem:[%s207_s0 + $0x1] sm:$0x1]   ;;  %vm27_vm4 = vcmask 851712   ;;  %vm33_vm5 = vcmask 786112  }
   0x9   :  { %s145_s0 = smov 8   ;;  %vm39_vm6 = vcmask 720512   ;;  %vm45_vm7 = vcmask 654912   ;;  %vm51_vm8 = vcmask 589312   ;;  %vm57_vm9 = vcmask 523712  }
   0xa   :  { %31 = vrot.lane.b32.xlu0 %v105_v4, %s135_s24  ;;  %37 = vrot.lane.b32.xlu1 %v106_v5, %s136_s25  ;;  %vm63_vm10 = vcmask 458112   ;;  %vm69_vm11 = vcmask 392512   ;;  %vm75_vm12 = vcmask 326912   ;;  %vm81_vm13 = vcmask 261312  }
   0xb   :  { %vm87_vm14 = vcmask 195712   ;;  %vm93_vm15 = vcmask 130112  }
   0xe   :  { %43 = vrot.lane.b32.xlu0 %v107_v7, %s137_s30  ;;  %49 = vrot.lane.b32.xlu1 %v108_v8, %s138_s2 }
  0x12   :  { %55 = vrot.lane.b32.xlu0 %v109_v9, %s139_s7  ;;  %61 = vrot.lane.b32.xlu1 %v110_v10, %s140_s8 }
  0x16   :  { %67 = vrot.lane.b32.xlu0 %v111_v11, %s141_s13  ;;  %73 = vrot.lane.b32.xlu1 %v112_v12, %s142_s14 }
  0x1a   :  { %79 = vrot.lane.b32.xlu0 %v113_v13, %s143_s19  ;;  %85 = vrot.lane.b32.xlu1 %v114_v14, %s144_s20 }
  0x1e   :  { %91 = vrot.lane.b32.xlu0 %v115_v15, %s145_s0 }
  0x74   :  { %v8_v16 = vpop.permute.xlu0 %7   ;;  %v20_v17 = vpop.permute.xlu1 %19  }
  0x75   :  { %10 = vst.msk [vmem:[#allocation0] sm:$0x1] %vm9_vm1, %v8_v16  }
  0x78   :  { %v14_v18 = vpop.permute.xlu0 %13   ;;  %v26_v19 = vpop.permute.xlu1 %25  }
  0x79   :  { %16 = vst.msk [vmem:[#allocation0] sm:$0x1] %vm15_vm2, %v14_v18  }
  0x7a   :  { %22 = vst.msk [vmem:[#allocation0] sm:$0x1] %vm21_vm3, %v20_v17  }
  0x7b   :  { %28 = vst.msk [vmem:[#allocation0] sm:$0x1] %vm27_vm4, %v26_v19  }
  0x7c   :  { %v32_v20 = vpop.permute.xlu0 %31   ;;  %v38_v21 = vpop.permute.xlu1 %37  }
  0x7d   :  { %34 = vst.msk [vmem:[#allocation0] sm:$0x1] %vm33_vm5, %v32_v20  }
  0x7e   :  { %40 = vst.msk [vmem:[#allocation0] sm:$0x1] %vm39_vm6, %v38_v21  }
  0x80   :  { %v44_v22 = vpop.permute.xlu0 %43   ;;  %v50_v23 = vpop.permute.xlu1 %49  }
  0x81   :  { %46 = vst.msk [vmem:[#allocation0] sm:$0x1] %vm45_vm7, %v44_v22  }
  0x82   :  { %52 = vst.msk [vmem:[#allocation0] sm:$0x1] %vm51_vm8, %v50_v23  }
  0x84   :  { %v56_v24 = vpop.permute.xlu0 %55   ;;  %v62_v25 = vpop.permute.xlu1 %61  }
  0x85   :  { %58 = vst.msk [vmem:[#allocation0] sm:$0x1] %vm57_vm9, %v56_v24  }
  0x86   :  { %64 = vst.msk [vmem:[#allocation0] sm:$0x1] %vm63_vm10, %v62_v25  }
  0x88   :  { %v68_v26 = vpop.permute.xlu0 %67   ;;  %v74_v27 = vpop.permute.xlu1 %73  }
  0x89   :  { %70 = vst.msk [vmem:[#allocation0] sm:$0x1] %vm69_vm11, %v68_v26  }
  0x8a   :  { %76 = vst.msk [vmem:[#allocation0] sm:$0x1] %vm75_vm12, %v74_v27  }
  0x8c   :  { %v80_v28 = vpop.permute.xlu0 %79   ;;  %v86_v29 = vpop.permute.xlu1 %85  }
  0x8d   :  { %82 = vst.msk [vmem:[#allocation0] sm:$0x1] %vm81_vm13, %v80_v28  }
  0x8e   :  { %88 = vst.msk [vmem:[#allocation0] sm:$0x1] %vm87_vm14, %v86_v29  }
  0x90   :  { %v92_v30 = vpop.permute.xlu0 %91  }
  0x91   :  { %94 = vst.msk [vmem:[#allocation0] sm:$0x1] %vm93_vm15, %v92_v30  }
  0x98   :  { %v98_v31 = vld [vmem:[#allocation0] sm:$0x1] }
  0x99   :  { %100 = vst [vmem:[%s208_s1] sm:$0x1] %v98_v31 }

// kernel: up_block_forward.1
= control target key start
LH: loop header
LB: loop body
LE: loop exit
PB: predicated region body
PF: predicated region fallthrough
CT: control target
= control target key end

     0   :  { %v1856_v1 = vmov 0   ;;  %vm125_vm0 = vcmask 523264   ;;  %v1857_v22 = vmov 0.0|0.0   ;;  %vm1858_vm1 = vmmov 0   ;;  %s2329_s1 = inlined_call_operand.vmem [shape: bf16[64,384], index: 1, kind: input, shape index: {}]   ;;  %s2330_s0 = inlined_call_operand.vmem [shape: f32[2,16,64], index: 0, kind: input, shape index: {}]   ;;  %s2331_s9 = inlined_call_operand.vmem [shape: f32[128,8], index: 9, kind: input, shape index: {}]   ;;  %s2332_s2 = inlined_call_operand.vmem [shape: f32[1,128], index: 2, kind: input, shape index: {}]   ;;  %s2333_s10 = inlined_call_operand.vmem [shape: f32[8,128], index: 10, kind: input, shape index: {}]   ;;  %s2334_s5 = inlined_call_operand.vmem [shape: bf16[128,384], index: 5, kind: input, shape index: {}]   ;;  %s2335_s3 = inlined_call_operand.vmem [shape: f32[1,128], index: 3, kind: input, shape index: {}]   ;;  %s2336_s4 = inlined_call_operand.vmem [shape: f32[1,128], index: 4, kind: input, shape index: {}]   ;;  %s2337_s11 = inlined_call_operand.vmem [shape: f32[2,16,128], index: 11, kind: output, shape index: {}]   ;;  %s2338_s6 = inlined_call_operand.vmem [shape: f32[1,128], index: 6, kind: input, shape index: {}]   ;;  %s2339_s7 = inlined_call_operand.vmem [shape: f32[1,128], index: 7, kind: input, shape index: {}]   ;;  %s2340_s8 = inlined_call_operand.vmem [shape: f32[1,128], index: 8, kind: input, shape index: {}]  }
   0x1   :  { %v1804_v0 = vld [vmem:[%s2329_s1 + $0x4] ss:$12 sps:$4 sm:$0xff]   ;;  %164 = vmatprep.mubr.bf16.mxu0 %v1856_v1  ;;  %v1806_v2 = vld [vmem:[%s2329_s1] ss:$12 sps:$4 sm:$0xff]   ;;  %v1807_v3 = vld [vmem:[%s2329_s1 + $0x1c] ss:$12 sps:$4 sm:$0xff]  }
   0x2   :  { %132 = vmatprep.subr.bf16.mxu0 %v1804_v0  ;;  %v1809_v4 = vld [vmem:[%s2329_s1 + $0x18] ss:$12 sps:$4 sm:$0xff]   ;;  %v1810_v5 = vld [vmem:[%s2329_s1 + $0x34] ss:$12 sps:$4 sm:$0xff]   ;;  %v1812_v6 = vld [vmem:[%s2329_s1 + $0x30] ss:$12 sps:$4 sm:$0xff]  }
   0x3   :  { %133 = vmatpush1.bf16.msra.mxu0 %v1806_v2  ;;  %v1816_v7 = vld [vmem:[%s2329_s1 + $0x8] ss:$12 sps:$4 sm:$0xff]   ;;  %v39_v8 = vld [vmem:[%s2330_s0] sm:$0xff]  ;;  %v1813_v12 = vld [vmem:[%s2329_s1 + $0x4c] ss:$12 sps:$4 sm:$0xff]   ;;  %v1859_v32 = vmov 0.0  }
   0x4   :  { %134 = vmatprep.subr.bf16.mxu0 %v1807_v3  ;;  %v40_v9 = vld [vmem:[%s2330_s0 + $0x8] sm:$0xff]  ;;  %1512 = vmatprep.subr.bf16.mxu1 %v1816_v7  ;;  %v1818_v13 = vld [vmem:[%s2329_s1 + $0x38] ss:$12 sps:$4 sm:$0xff]   ;;  %v1819_v15 = vld [vmem:[%s2329_s1 + $0x50] ss:$12 sps:$4 sm:$0xff]   ;;  %vm258_vm2 = vcmask 1046528  }
   0x5   :  { %v43_v10 = vpack.c.bf16 %v40_v9, %v39_v8  ;;  %v1817_v11 = vld [vmem:[%s2329_s1 + $0x20] ss:$12 sps:$4 sm:$0xff]   ;;  %1513 = vmatpush3.bf16.msra.mxu1 %v1816_v7  ;;  %v1815_v14 = vld [vmem:[%s2329_s1 + $0x48] ss:$12 sps:$4 sm:$0xff]   ;;  %v42_v17 = vld [vmem:[%s2330_s0 + $0x18] sm:$0xff]  ;;  %vm389_vm3 = vcmask 64512  }
   0x6   :  { %1514 = vmatprep.subr.bf16.mxu1 %v1817_v11  ;;  %v41_v16 = vld [vmem:[%s2330_s0 + $0x10] sm:$0xff]  ;;  %v301_v19 = vld [vmem:[%s2331_s9] sm:$0xff]  ;;  %v302_v20 = vld [vmem:[%s2331_s9 + $0x8] sm:$0xff] }
   0x7   :  { %135 = vmatpush1.bf16.msra.mxu0 %v1809_v4  ;;  %1520 = vmatprep.mubr.msk.bf16.mxu1 %vm125_vm0, %v43_v10  ;;  %v44_v18 = vpack.c.bf16 %v42_v17, %v41_v16  ;;  %v1980_v21 = vpack.c.bf16 %v302_v20, %v301_v19  ;;  %v303_v23 = vld [vmem:[%s2331_s9 + $0x10] sm:$0xff]  ;;  %v304_v24 = vld [vmem:[%s2331_s9 + $0x18] sm:$0xff]  ;;  %v305_v26 = vld [vmem:[%s2331_s9 + $0x20] sm:$0xff] }
   0x8   :  { %136 = vmatprep.subr.bf16.mxu0 %v1810_v5  ;;  %v1994_v25 = vpack.c.bf16 %v304_v24, %v303_v23  ;;  %v306_v27 = vld [vmem:[%s2331_s9 + $0x28] sm:$0xff]  ;;  %v307_v29 = vld [vmem:[%s2331_s9 + $0x30] sm:$0xff]  ;;  %v308_v30 = vld [vmem:[%s2331_s9 + $0x38] sm:$0xff] }
   0x9   :  { %1515 = vmatpush3.bf16.msra.mxu1 %v1817_v11  ;;  %v2006_v28 = vpack.c.bf16 %v306_v27, %v305_v26  ;;  %v2015_v31 = vpack.c.bf16 %v308_v30, %v307_v29  ;;  %v309_v33 = vld [vmem:[%s2331_s9 + $0x40] sm:$0xff]  ;;  %v310_v34 = vld [vmem:[%s2331_s9 + $0x48] sm:$0xff]  ;;  %v311_v36 = vld [vmem:[%s2331_s9 + $0x50] sm:$0xff] }
   0xa   :  { %1516 = vmatprep.subr.bf16.mxu1 %v1818_v13  ;;  %v2031_v35 = vpack.c.bf16 %v310_v34, %v309_v33  ;;  %v312_v37 = vld [vmem:[%s2331_s9 + $0x58] sm:$0xff]  ;;  %v313_v39 = vld [vmem:[%s2331_s9 + $0x60] sm:$0xff]  ;;  %v314_v40 = vld [vmem:[%s2331_s9 + $0x68] sm:$0xff] }
   0xb   :  { %137 = vmatpush1.bf16.msra.mxu0 %v1812_v6  ;;  %v2043_v38 = vpack.c.bf16 %v312_v37, %v311_v36  ;;  %v2055_v41 = vpack.c.bf16 %v314_v40, %v313_v39  ;;  %v315_v42 = vld [vmem:[%s2331_s9 + $0x70] sm:$0xff]  ;;  %v316_v43 = vld [vmem:[%s2331_s9 + $0x78] sm:$0xff]  ;;  %v1386_v16 = vld [vmem:[%s2332_s2] ss:$0 sm:$0xff] }
   0xc   :  { %138 = vmatprep.subr.bf16.mxu0 %v1813_v12  ;;  %v2067_v44 = vpack.c.bf16 %v316_v43, %v315_v42  ;;  %v2083_v40 = vld [vmem:[%s2333_s10] sm:$0xff] }
   0xd   :  { %1517 = vmatpush3.bf16.msra.mxu1 %v1818_v13 }
   0xe   :  { %1518 = vmatprep.subr.bf16.mxu1 %v1819_v15 }
   0xf   :  { %139 = vmatpush1.bf16.msra.mxu0 %v1815_v14 }
  0x10   :  { %1704 = vmatprep.subr.bf16.mxu0 %v1857_v22 }
  0x11   :  { %1519 = vmatpush3.bf16.msra.mxu1 %v1819_v15 }
  0x12   :  { %1382 = vmatmul.mubr.msk.bf16.vlgmr.msra.gmra.mrb[0].mxu0 %vm125_vm0, %v43_v10  ;;  %1728 = vmatprep.subr.bf16.mxu1 %v1857_v22 }
  0x13   :  { %174 = vmatprep.mubr.bf16.mxu0 %v1856_v1  ;;  %1706 = vmatpush3.bf16.msra.mxu0 %v1980_v21 }
  0x14   :  { %1521 = vmatmul.mubr.msk.bf16.vlgmr.msra.gmra.mrb[0].mxu1 %vm125_vm0, %v44_v18  ;;  %1707 = vmatprep.subr.bf16.mxu0 %v1857_v22 }
  0x15   :  { %1730 = vmatpush3.bf16.msra.mxu1 %v1980_v21  ;;  %1596 = vmatprep.mubr.msk.f32.mxu1 %vm1858_vm1, %v1859_v32 }
  0x16   :  { %1731 = vmatprep.subr.bf16.mxu1 %v1857_v22 }
  0x17   :  { %1709 = vmatpush3.bf16.msra.mxu0 %v1994_v25 }
  0x18   :  { %1710 = vmatprep.subr.bf16.mxu0 %v1857_v22 }
  0x19   :  { %1733 = vmatpush3.bf16.msra.mxu1 %v1994_v25 }
  0x1a   :  { %1383 = vmatmul.mubr.msk.bf16.gmra.mrb[4].mxu0 %vm125_vm0, %v44_v18  ;;  %1734 = vmatprep.subr.bf16.mxu1 %v1857_v22 }
  0x1b   :  { %1712 = vmatpush3.bf16.msra.mxu0 %v2006_v28  ;;  %1556 = vmatprep.mubr.msk.f32.mxu0 %vm1858_vm1, %v1859_v32 }
  0x1c   :  { %1713 = vmatprep.subr.bf16.mxu0 %v1857_v22 }
  0x1d   :  { %1736 = vmatpush3.bf16.msra.mxu1 %v2006_v28 }
  0x1e   :  { %1737 = vmatprep.subr.bf16.mxu1 %v1857_v22 }
  0x1f   :  { %1715 = vmatpush3.bf16.msra.mxu0 %v2015_v31 }
  0x20   :  { %1716 = vmatprep.subr.bf16.mxu0 %v1857_v22 }
  0x21   :  { %1739 = vmatpush3.bf16.msra.mxu1 %v2015_v31 }
  0x22   :  { %1740 = vmatprep.subr.bf16.mxu1 %v1857_v22 }
  0x23   :  { %1718 = vmatpush3.bf16.msra.mxu0 %v2031_v35 }
  0x24   :  { %1719 = vmatprep.subr.bf16.mxu0 %v1857_v22 }
  0x25   :  { %1742 = vmatpush3.bf16.msra.mxu1 %v2031_v35 }
  0x26   :  { %1743 = vmatprep.subr.bf16.mxu1 %v1857_v22 }
  0x27   :  { %1721 = vmatpush3.bf16.msra.mxu0 %v2043_v38 }
  0x28   :  { %1722 = vmatprep.subr.bf16.mxu0 %v1857_v22 }
  0x29   :  { %1745 = vmatpush3.bf16.msra.mxu1 %v2043_v38 }
  0x2a   :  { %1746 = vmatprep.subr.bf16.mxu1 %v1857_v22 }
  0x2b   :  { %1724 = vmatpush3.bf16.msra.mxu0 %v2055_v41 }
  0x2c   :  { %1725 = vmatprep.subr.bf16.mxu0 %v1857_v22 }
  0x2d   :  { %1748 = vmatpush3.bf16.msra.mxu1 %v2055_v41 }
  0x2e   :  { %1749 = vmatprep.subr.bf16.mxu1 %v1857_v22 }
  0x2f   :  { %1727 = vmatpush3.bf16.msra.mxu0 %v2067_v44 }
  0x30   :  { %1559 = vmatprep.subr.mxu0 %v1859_v32 }
  0x31   :  { %1751 = vmatpush3.bf16.msra.mxu1 %v2067_v44 }
  0xe5   :  { %v166_v45 = vpop.f32.mrb[0].mxu0 }
  0xe6   :  { %v168_v46 = vpop.f32.mrb[1].mxu0 }
  0xe7   :  { %234 = vst [vmem:[#allocation2] sm:$0xff] %v168_v46  ;;  %v170_v47 = vpop.f32.mrb[2].mxu0  ;;  %v1522_v49 = vpop.f32.mrb[0].mxu1  ;;  %v463_v46 = vlaneseq }
  0xe8   :  { %v172_v48 = vpop.f32.mrb[3].mxu0  ;;  %v262_v50 = vrot.slane %v1522_v49, 1  ;;  %v219_v51 = vpop.f32.mrb[1].mxu1 }
  0xe9   :  { %235 = vst [vmem:[#allocation2 + $0x8] sm:$0xff] %v172_v48  ;;  %v259_v53 = vrot.slane %v219_v51, 1  ;;  %v1523_v54 = vpop.f32.mrb[2].mxu1 }
  0xea   :  { %v263_v56 = vrot.slane %v1523_v54, 1  ;;  %v222_v57 = vpop.f32.mrb[3].mxu1 }
  0xeb   :  { %v260_v59 = vrot.slane %v222_v57, 1 }
  0xec   :  { %v264_v63 = vsel %vm258_vm2, %v262_v50, %v263_v56 }
  0xed   :  { %v176_v52 = vpop.f32.mrb[4].mxu0  ;;  %v261_v3 = vsel %vm258_vm2, %v259_v53, %v260_v59 }
  0xee   :  { %v178_v55 = vpop.f32.mrb[5].mxu0 }
  0xef   :  { %236 = vst [vmem:[#allocation2 + $0x10] sm:$0xff] %v178_v55  ;;  %v180_v58 = vpop.f32.mrb[6].mxu0 }
  0xf0   :  { %v238_v60 = vld [vmem:[#allocation2 + $0x1] sm:$0xff]  ;;  %v239_v61 = vld [vmem:[#allocation2 + $0x9] sm:$0x7f]  ;;  %v182_v62 = vpop.f32.mrb[7].mxu0 }
  0xf1   :  { %v242_v0 = vadd.f32 %v238_v60, %v166_v45  ;;  %v243_v2 = vadd.f32 %v239_v61, %v170_v47  ;;  %237 = vst [vmem:[#allocation2 + $0x18] sm:$0xff] %v182_v62  ;;  %v464_v47 = vshrl.u32 %v463_v46, 7 }
  0xf3   :  { %246 = vst [vmem:[#allocation2 + $0x1] sm:$0xff] %v242_v0  ;;  %247 = vst [vmem:[#allocation2 + $0x9] sm:$0x7f] %v243_v2  ;;  %v2093_v48 = vsub.s32 0, %v464_v47 }
  0xf8   :  { %v240_v4 = vld [vmem:[#allocation2 + $0x11] sm:$0xff]  ;;  %v241_v5 = vld [vmem:[#allocation2 + $0x19] sm:$0x7f] }
  0xf9   :  { %v244_v6 = vadd.f32 %v240_v4, %v176_v52  ;;  %v245_v7 = vadd.f32 %v241_v5, %v180_v58 }
  0xfa   :  { %v251_v8 = vld [vmem:[#allocation2 + $0x8] sm:$0x7f]  ;;  %v250_v10 = vld [vmem:[#allocation2] sm:$0xff] }
  0xfb   :  { %248 = vst [vmem:[#allocation2 + $0x11] sm:$0xff] %v244_v6  ;;  %249 = vst [vmem:[#allocation2 + $0x19] sm:$0x7f] %v245_v7  ;;  %v270_v9 = vadd.f32 %v260_v59, %v251_v8  ;;  %v269_v13 = vadd.f32 %v261_v3, %v250_v10  ;;  %v1820_v10 = vld [vmem:[%s2334_s5] ss:$12 sps:$4 sm:$0xff]  }
  0xfd   :  { %274 = vst [vmem:[#allocation2 + $0x8] sm:$0x7f] %v270_v9  ;;  %v288_v19 = vadd.f32 %v1386_v16, %v269_v13  ;;  %v1822_v9 = vld [vmem:[%s2334_s5 + $0x4] ss:$12 sps:$4 sm:$0xff]  }
  0xfe   :  { %v1824_v13 = vld [vmem:[%s2334_s5 + $0x18] ss:$12 sps:$4 sm:$0xff]  }
 0x102   :  { %v253_v11 = vld [vmem:[#allocation2 + $0x18] sm:$0x7f]  ;;  %v252_v14 = vld [vmem:[#allocation2 + $0x10] sm:$0xff] }
 0x103   :  { %v272_v12 = vadd.f32 %v263_v56, %v253_v11  ;;  %v271_v18 = vadd.f32 %v264_v63, %v252_v14  ;;  %v1823_v11 = vld [vmem:[%s2334_s5 + $0x8] ss:$12 sps:$4 sm:$0xff]   ;;  %v1827_v14 = vld [vmem:[%s2334_s5 + $0x20] ss:$12 sps:$4 sm:$0xff]  }
 0x104   :  { %v278_v15 = vld [vmem:[#allocation2 + $0x8] sm:$0xff]  ;;  %1604 = vmatprep.subr.bf16.mxu1 %v1823_v11 }
 0x105   :  { %276 = vst [vmem:[#allocation2 + $0x18] sm:$0x7f] %v272_v12  ;;  %v289_v17 = vadd.f32 %v1386_v16, %v278_v15  ;;  %v290_v23 = vadd.f32 %v1386_v16, %v271_v18  ;;  %v1826_v12 = vld [vmem:[%s2334_s5 + $0x1c] ss:$12 sps:$4 sm:$0xff]   ;;  %v1830_v15 = vld [vmem:[%s2334_s5 + $0x34] ss:$12 sps:$4 sm:$0xff]  }
 0x106   :  { %v1834_v18 = vld [vmem:[%s2334_s5 + $0x4c] ss:$12 sps:$4 sm:$0xff]  }
 0x107   :  { %v292_v20 = vadd.f32 %v289_v17, %v288_v19 }
 0x109   :  { %v293_v27 = vadd.f32 %v292_v20, %v290_v23  ;;  %v1835_v20 = vld [vmem:[%s2334_s5 + $0x50] ss:$12 sps:$4 sm:$0xff]  }
 0x10c   :  { %v280_v24 = vld [vmem:[#allocation2 + $0x18] sm:$0xff] }
 0x10d   :  { %v291_v26 = vadd.f32 %v1386_v16, %v280_v24  ;;  %v1828_v16 = vld [vmem:[%s2334_s5 + $0x30] ss:$12 sps:$4 sm:$0xff]   ;;  %v1836_v24 = vld [vmem:[%s2334_s5 + $0x60] ss:$12 sps:$4 sm:$0xff]  }
 0x10f   :  { %v294_v29 = vadd.f32 %v293_v27, %v291_v26  ;;  %v1842_v27 = vld [vmem:[%s2334_s5 + $0x7c] ss:$12 sps:$4 sm:$0xff]  }
 0x111   :  { %v295_v30 = vrot.slane %v294_v29, 4 }
 0x113   :  { %v296_v33 = vadd.f32 %v295_v30, %v294_v29  ;;  %v1840_v29 = vld [vmem:[%s2334_s5 + $0x78] ss:$12 sps:$4 sm:$0xff]   ;;  %v1843_v30 = vld [vmem:[%s2334_s5 + $0x80] ss:$12 sps:$4 sm:$0xff]  }
 0x115   :  { %v297_v34 = vrot.slane %v296_v33, 2 }
 0x117   :  { %v298_v36 = vadd.f32 %v297_v34, %v296_v33  ;;  %v1846_v33 = vld [vmem:[%s2334_s5 + $0x94] ss:$12 sps:$4 sm:$0xff]   ;;  %v1844_v34 = vld [vmem:[%s2334_s5 + $0x90] ss:$12 sps:$4 sm:$0xff]  }
 0x119   :  { %v299_v37 = vrot.slane %v298_v36, 1 }
 0x11b   :  { %v300_v39 = vadd.f32 %v299_v37, %v298_v36  ;;  %v1847_v36 = vld [vmem:[%s2334_s5 + $0x98] ss:$12 sps:$4 sm:$0xff]  }
 0x11c   :  { %v1850_v37 = vld [vmem:[%s2334_s5 + $0xac] ss:$12 sps:$4 sm:$0xff]  }
 0x11d   :  { %1557 = vmatmul.mubr.f32.vlgmr.msra.gmra.mrb[8].mxu0 %v300_v39  ;;  %v1848_v39 = vld [vmem:[%s2334_s5 + $0xa8] ss:$12 sps:$4 sm:$0xff]  }
 0x11e   :  { %1560 = vmatpush3.msra.mxu0 %v2083_v40  ;;  %1561 = vmatprep.mubr.msk.f32.mxu0 %vm1858_vm1, %v1859_v32 }
 0x11f   :  { %1599 = vmatprep.subr.mxu0 %v1859_v32 }
 0x1f0   :  { %v383_v42 = vpop.f32.mrb[8].mxu0 }
 0x1f1   :  { %v387_v43 = vmul.f32 0.001953125, %v383_v42  ;;  %v1558_v45 = vpop.f32.mrb[9].mxu0  ;;  %v1851_v42 = vld [vmem:[%s2334_s5 + $0xb0] ss:$12 sps:$4 sm:$0xff]  }
 0x1f3   :  { %1562 = vmatmul.mubr.msk.f32.vlgmr.msra.gmra.mrb[10].mxu0 %vm389_vm3, %v387_v43 }
 0x1f4   :  { %1600 = vmatpush3.msra.mxu0 %v2083_v40  ;;  %1601 = vmatprep.mubr.msk.f32.mxu0 %vm1858_vm1, %v1859_v32 }
 0x1f5   :  { %833 = vmatprep.subr.bf16.mxu0 %v1822_v9 }
 0x2c6   :  { %v459_v49 = vpop.f32.mrb[10].mxu0 }
 0x2c7   :  { %v466_v50 = vrot.slane %v459_v49, %v2093_v48  ;;  %v1563_v51 = vpop.f32.mrb[11].mxu0 }
 0x2c9   :  { %v2096_v52 = vsub.f32 %v288_v19, %v466_v50  ;;  %v2098_v53 = vsub.f32 %v289_v17, %v466_v50  ;;  %v2100_v54 = vsub.f32 %v290_v23, %v466_v50  ;;  %v2102_v55 = vsub.f32 %v291_v26, %v466_v50  ;;  %v1831_v17 = vld [vmem:[%s2334_s5 + $0x38] ss:$12 sps:$4 sm:$0xff]   ;;  %v1832_v19 = vld [vmem:[%s2334_s5 + $0x48] ss:$12 sps:$4 sm:$0xff]   ;;  %v1389_v50 = vld [vmem:[%s2335_s3] ss:$0 sm:$0xff] }
 0x2ca   :  { %v1838_v23 = vld [vmem:[%s2334_s5 + $0x64] ss:$12 sps:$4 sm:$0xff]   ;;  %v1839_v26 = vld [vmem:[%s2334_s5 + $0x68] ss:$12 sps:$4 sm:$0xff]  }
 0x2cb   :  { %v471_v56 = vmul.f32 %v2096_v52, %v2096_v52  ;;  %v472_v57 = vmul.f32 %v2098_v53, %v2098_v53  ;;  %v473_v58 = vmul.f32 %v2100_v54, %v2100_v54  ;;  %v474_v60 = vmul.f32 %v2102_v55, %v2102_v55 }
 0x2cd   :  { %v475_v59 = vadd.f32 %v472_v57, %v471_v56 }
 0x2cf   :  { %v476_v61 = vadd.f32 %v475_v59, %v473_v58  ;;  %v1390_v59 = vld [vmem:[%s2336_s4] ss:$0 sm:$0xff] }
 0x2d1   :  { %v477_v62 = vadd.f32 %v476_v61, %v474_v60 }
 0x2d3   :  { %v478_v63 = vrot.slane %v477_v62, 4 }
 0x2d5   :  { %v479_v0 = vadd.f32 %v478_v63, %v477_v62 }
 0x2d7   :  { %v480_v2 = vrot.slane %v479_v0, 2 }
 0x2d9   :  { %v481_v3 = vadd.f32 %v480_v2, %v479_v0 }
 0x2db   :  { %v482_v4 = vrot.slane %v481_v3, 1 }
 0x2dd   :  { %v483_v5 = vadd.f32 %v482_v4, %v481_v3 }
 0x2df   :  { %1597 = vmatmul.mubr.f32.vlgmr.msra.gmra.mrb[4].mxu1 %v483_v5 }
 0x2e0   :  { %1605 = vmatpush3.bf16.msra.mxu1 %v1823_v11 }
 0x2e1   :  { %1606 = vmatprep.subr.bf16.mxu1 %v1827_v14 }
 0x2e4   :  { %1607 = vmatpush3.bf16.msra.mxu1 %v1827_v14 }
 0x2e5   :  { %1608 = vmatprep.subr.bf16.mxu1 %v1831_v17 }
 0x2e8   :  { %1609 = vmatpush3.bf16.msra.mxu1 %v1831_v17 }
 0x2e9   :  { %1610 = vmatprep.subr.bf16.mxu1 %v1835_v20 }
 0x2ec   :  { %1611 = vmatpush3.bf16.msra.mxu1 %v1835_v20 }
 0x2ed   :  { %1612 = vmatprep.subr.bf16.mxu1 %v1839_v26 }
 0x2f0   :  { %1613 = vmatpush3.bf16.msra.mxu1 %v1839_v26 }
 0x2f1   :  { %1614 = vmatprep.subr.bf16.mxu1 %v1843_v30 }
 0x2f4   :  { %1615 = vmatpush3.bf16.msra.mxu1 %v1843_v30 }
 0x2f5   :  { %1616 = vmatprep.subr.bf16.mxu1 %v1847_v36 }
 0x2f8   :  { %1617 = vmatpush3.bf16.msra.mxu1 %v1847_v36 }
 0x2f9   :  { %1618 = vmatprep.subr.bf16.mxu1 %v1851_v42 }
 0x2fc   :  { %1619 = vmatpush3.bf16.msra.mxu1 %v1851_v42 }
 0x2fd   :  { %1659 = vmatprep.subr.mxu1 %v1859_v32 }
 0x3b2   :  { %v550_v6 = vpop.f32.mrb[4].mxu1 }
 0x3b3   :  { %v554_v7 = vmul.f32 0.001953125, %v550_v6  ;;  %v1598_v8 = vpop.f32.mrb[5].mxu1 }
 0x3b5   :  { %1602 = vmatmul.mubr.msk.f32.vlgmr.msra.gmra.mrb[12].mxu0 %vm389_vm3, %v554_v7 }
 0x3b6   :  { %865 = vmatprep.mubr.bf16.mxu0 %v1856_v1  ;;  %834 = vmatpush1.bf16.msra.mxu0 %v1820_v10 }
 0x3b7   :  { %835 = vmatprep.subr.bf16.mxu0 %v1826_v12 }
 0x3ba   :  { %836 = vmatpush1.bf16.msra.mxu0 %v1824_v13 }
 0x3bb   :  { %837 = vmatprep.subr.bf16.mxu0 %v1830_v15 }
 0x3be   :  { %838 = vmatpush1.bf16.msra.mxu0 %v1828_v16 }
 0x3bf   :  { %839 = vmatprep.subr.bf16.mxu0 %v1834_v18 }
 0x3c2   :  { %840 = vmatpush1.bf16.msra.mxu0 %v1832_v19 }
 0x3c3   :  { %841 = vmatprep.subr.bf16.mxu0 %v1838_v23 }
 0x3c6   :  { %842 = vmatpush1.bf16.msra.mxu0 %v1836_v24 }
 0x3c7   :  { %843 = vmatprep.subr.bf16.mxu0 %v1842_v27 }
 0x3ca   :  { %844 = vmatpush1.bf16.msra.mxu0 %v1840_v29 }
 0x3cb   :  { %845 = vmatprep.subr.bf16.mxu0 %v1846_v33 }
 0x3ce   :  { %846 = vmatpush1.bf16.msra.mxu0 %v1844_v34 }
 0x3cf   :  { %847 = vmatprep.subr.bf16.mxu0 %v1850_v37 }
 0x3d2   :  { %848 = vmatpush1.bf16.msra.mxu0 %v1848_v39 }
 0x3d3   :  { %1752 = vmatprep.subr.bf16.mxu0 %v1857_v22 }
 0x488   :  { %v624_v43 = vpop.f32.mrb[12].mxu0 }
 0x489   :  { %v625_v45 = vadd.f32 1e-05, %v624_v43  ;;  %v1603_v46 = vpop.f32.mrb[13].mxu0 }
 0x48b   :  { %1852 = vrsqrt.f32 %v625_v45 }
 0x495   :  { %v1853_v47 = vpop.eup %1852 }
 0x496   :  { %v632_v49 = vrot.slane %v1853_v47, %v2093_v48 }
 0x498   :  { %v633_v51 = vmul.f32 %v632_v49, %v2096_v52  ;;  %v634_v56 = vmul.f32 %v632_v49, %v2098_v53  ;;  %v635_v57 = vmul.f32 %v632_v49, %v2100_v54  ;;  %v636_v58 = vmul.f32 %v632_v49, %v2102_v55 }
 0x49a   :  { %v644_v60 = vmul.f32 %v1389_v50, %v633_v51  ;;  %v645_v61 = vmul.f32 %v1389_v50, %v634_v56  ;;  %v646_v62 = vmul.f32 %v1389_v50, %v635_v57  ;;  %v647_v63 = vmul.f32 %v1389_v50, %v636_v58  ;;  %v1415_v56 = vld [vmem:[%s2338_s6] ss:$0 sm:$0xff] }
 0x49c   :  { %v655_v0 = vadd.f32 %v1390_v59, %v644_v60  ;;  %v656_v2 = vadd.f32 %v1390_v59, %v645_v61  ;;  %v657_v3 = vadd.f32 %v1390_v59, %v646_v62  ;;  %v658_v4 = vadd.f32 %v1390_v59, %v647_v63 }
 0x49e   :  { %v659_v5 = vmax.f32 %v655_v0, 0.0  ;;  %v660_v52 = vmax.f32 %v656_v2, 0.0  ;;  %v661_v6 = vmax.f32 %v657_v3, 0.0  ;;  %v662_v53 = vmax.f32 %v658_v4, 0.0 }
 0x4a0   :  { %663 = vst [vmem:[#allocation2] sm:$0xff] %v659_v5  ;;  %665 = vst [vmem:[#allocation2 + $0x10] sm:$0xff] %v661_v6  ;;  %v671_v54 = vpack.c.bf16 %v660_v52, %v659_v5  ;;  %v672_v55 = vpack.c.bf16 %v662_v53, %v661_v6 }
 0x4a1   :  { %664 = vst [vmem:[#allocation2 + $0x8] sm:$0xff] %v660_v52  ;;  %666 = vst [vmem:[#allocation2 + $0x18] sm:$0xff] %v662_v53 }
 0x4a2   :  { %866 = vmatmul.mubr.bf16.vlgmr.msra.gmra.mrb[16].mxu0 %v671_v54  ;;  %1620 = vmatprep.mubr.bf16.mxu1 %v671_v54 }
 0x4a3   :  { %1621 = vmatmul.mubr.bf16.vlgmr.msra.gmra.mrb[8].mxu1 %v672_v55  ;;  %875 = vmatprep.mubr.bf16.mxu0 %v1856_v1 }
 0x4a4   :  { %1754 = vmatpush3.bf16.msra.mxu0 %v1980_v21  ;;  %1660 = vmatpush3.msra.mxu1 %v2083_v40 }
 0x4a5   :  { %1755 = vmatprep.subr.bf16.mxu0 %v1857_v22  ;;  %1661 = vmatprep.mubr.msk.f32.mxu1 %vm1858_vm1, %v1859_v32 }
 0x4a6   :  { %1776 = vmatprep.subr.bf16.mxu1 %v1857_v22 }
 0x4a8   :  { %1757 = vmatpush3.bf16.msra.mxu0 %v1994_v25 }
 0x4a9   :  { %1758 = vmatprep.subr.bf16.mxu0 %v1857_v22 }
 0x4aa   :  { %876 = vmatmul.mubr.bf16.gmra.mrb[20].mxu0 %v672_v55 }
 0x4ab   :  { %1656 = vmatprep.mubr.msk.f32.mxu0 %vm1858_vm1, %v1859_v32 }
 0x4ac   :  { %1760 = vmatpush3.bf16.msra.mxu0 %v2006_v28 }
 0x4ad   :  { %1761 = vmatprep.subr.bf16.mxu0 %v1857_v22 }
 0x4b0   :  { %1763 = vmatpush3.bf16.msra.mxu0 %v2015_v31 }
 0x4b1   :  { %1764 = vmatprep.subr.bf16.mxu0 %v1857_v22 }
 0x4b4   :  { %1766 = vmatpush3.bf16.msra.mxu0 %v2031_v35 }
 0x4b5   :  { %1767 = vmatprep.subr.bf16.mxu0 %v1857_v22 }
 0x4b8   :  { %1769 = vmatpush3.bf16.msra.mxu0 %v2043_v38 }
 0x4b9   :  { %1770 = vmatprep.subr.bf16.mxu0 %v1857_v22 }
 0x4bc   :  { %1772 = vmatpush3.bf16.msra.mxu0 %v2055_v41 }
 0x4bd   :  { %1773 = vmatprep.subr.bf16.mxu0 %v1857_v22 }
 0x4c0   :  { %1775 = vmatpush3.bf16.msra.mxu0 %v2067_v44 }
 0x4c1   :  { %1699 = vmatprep.subr.mxu0 %v1859_v32 }
 0x575   :  { %v867_v1 = vpop.f32.mrb[16].mxu0 }
 0x576   :  { %v869_v7 = vpop.f32.mrb[17].mxu0  ;;  %v1622_v8 = vpop.f32.mrb[8].mxu1 }
 0x577   :  { %935 = vst [vmem:[%s2337_s11] sm:$0xff] %v869_v7  ;;  %v871_v9 = vpop.f32.mrb[18].mxu0  ;;  %v920_v10 = vpop.f32.mrb[9].mxu1  ;;  %v962_v13 = vrot.slane %v1622_v8, 1 }
 0x578   :  { %v873_v11 = vpop.f32.mrb[19].mxu0  ;;  %v1623_v12 = vpop.f32.mrb[10].mxu1  ;;  %v959_v16 = vrot.slane %v920_v10, 1 }
 0x579   :  { %936 = vst [vmem:[%s2337_s11 + $0x8] sm:$0xff] %v873_v11  ;;  %v963_v14 = vrot.slane %v1623_v12, 1  ;;  %v923_v15 = vpop.f32.mrb[11].mxu1 }
 0x57a   :  { %v960_v17 = vrot.slane %v923_v15, 1 }
 0x57b   :  { %v964_v18 = vsel %vm258_vm2, %v962_v13, %v963_v14 }
 0x57c   :  { %v961_v19 = vsel %vm258_vm2, %v959_v16, %v960_v17 }
 0x57d   :  { %v877_v20 = vpop.f32.mrb[20].mxu0 }
 0x57e   :  { %v879_v23 = vpop.f32.mrb[21].mxu0 }
 0x57f   :  { %937 = vst [vmem:[%s2337_s11 + $0x10] sm:$0xff] %v879_v23  ;;  %v881_v24 = vpop.f32.mrb[22].mxu0 }
 0x580   :  { %v939_v26 = vld [vmem:[%s2337_s11 + $0x1] sm:$0xff]  ;;  %v940_v27 = vld [vmem:[%s2337_s11 + $0x9] sm:$0x7f]  ;;  %v883_v29 = vpop.f32.mrb[23].mxu0 }
 0x581   :  { %v943_v30 = vadd.f32 %v939_v26, %v867_v1  ;;  %v944_v33 = vadd.f32 %v940_v27, %v871_v9  ;;  %938 = vst [vmem:[%s2337_s11 + $0x18] sm:$0xff] %v883_v29  ;;  %v1418_v27 = vld [vmem:[%s2339_s7] ss:$0 sm:$0xff] }
 0x583   :  { %947 = vst [vmem:[%s2337_s11 + $0x1] sm:$0xff] %v943_v30  ;;  %948 = vst [vmem:[%s2337_s11 + $0x9] sm:$0x7f] %v944_v33 }
 0x588   :  { %v941_v34 = vld [vmem:[%s2337_s11 + $0x11] sm:$0xff]  ;;  %v942_v36 = vld [vmem:[%s2337_s11 + $0x19] sm:$0x7f] }
 0x589   :  { %v945_v37 = vadd.f32 %v941_v34, %v877_v20  ;;  %v946_v39 = vadd.f32 %v942_v36, %v881_v24  ;;  %v1419_v36 = vld [vmem:[%s2340_s8] ss:$0 sm:$0xff] }
 0x58a   :  { %v952_v42 = vld [vmem:[%s2337_s11 + $0x8] sm:$0x7f]  ;;  %v951_v45 = vld [vmem:[%s2337_s11] sm:$0xff] }
 0x58b   :  { %v970_v43 = vadd.f32 %v960_v17, %v952_v42  ;;  %949 = vst [vmem:[%s2337_s11 + $0x11] sm:$0xff] %v945_v37  ;;  %950 = vst [vmem:[%s2337_s11 + $0x19] sm:$0x7f] %v946_v39  ;;  %v969_v47 = vadd.f32 %v961_v19, %v951_v45 }
 0x58d   :  { %974 = vst [vmem:[%s2337_s11 + $0x8] sm:$0x7f] %v970_v43  ;;  %v988_v59 = vadd.f32 %v1415_v56, %v969_v47 }
 0x592   :  { %v954_v46 = vld [vmem:[%s2337_s11 + $0x18] sm:$0x7f]  ;;  %v953_v50 = vld [vmem:[%s2337_s11 + $0x10] sm:$0xff] }
 0x593   :  { %v972_v49 = vadd.f32 %v963_v14, %v954_v46  ;;  %v971_v58 = vadd.f32 %v964_v18, %v953_v50 }
 0x594   :  { %v978_v51 = vld [vmem:[%s2337_s11 + $0x8] sm:$0xff] }
 0x595   :  { %976 = vst [vmem:[%s2337_s11 + $0x18] sm:$0x7f] %v972_v49  ;;  %v989_v57 = vadd.f32 %v1415_v56, %v978_v51  ;;  %v990_v61 = vadd.f32 %v1415_v56, %v971_v58 }
 0x597   :  { %v992_v60 = vadd.f32 %v989_v57, %v988_v59 }
 0x599   :  { %v993_v0 = vadd.f32 %v992_v60, %v990_v61 }
 0x59c   :  { %v980_v62 = vld [vmem:[%s2337_s11 + $0x18] sm:$0xff] }
 0x59d   :  { %v991_v63 = vadd.f32 %v1415_v56, %v980_v62 }
 0x59f   :  { %v994_v2 = vadd.f32 %v993_v0, %v991_v63 }
 0x5a1   :  { %v995_v3 = vrot.slane %v994_v2, 4 }
 0x5a3   :  { %v996_v4 = vadd.f32 %v995_v3, %v994_v2 }
 0x5a5   :  { %v997_v5 = vrot.slane %v996_v4, 2 }
 0x5a7   :  { %v998_v52 = vadd.f32 %v997_v5, %v996_v4 }
 0x5a9   :  { %v999_v6 = vrot.slane %v998_v52, 1 }
 0x5ab   :  { %v1000_v53 = vadd.f32 %v999_v6, %v998_v52 }
 0x5ad   :  { %1657 = vmatmul.mubr.f32.vlgmr.msra.gmra.mrb[14].mxu0 %v1000_v53 }
 0x5ae   :  { %1700 = vmatpush3.msra.mxu0 %v2083_v40  ;;  %1701 = vmatprep.mubr.msk.f32.mxu0 %vm1858_vm1, %v1859_v32 }
 0x680   :  { %v1083_v54 = vpop.f32.mrb[14].mxu0 }
 0x681   :  { %v1087_v55 = vmul.f32 0.001953125, %v1083_v54  ;;  %v1658_v1 = vpop.f32.mrb[15].mxu0 }
 0x683   :  { %1662 = vmatmul.mubr.msk.f32.vlgmr.msra.gmra.mrb[6].mxu1 %vm389_vm3, %v1087_v55 }
 0x684   :  { %1778 = vmatpush3.bf16.msra.mxu1 %v1980_v21  ;;  %1696 = vmatprep.mubr.msk.f32.mxu1 %vm1858_vm1, %v1859_v32 }
 0x685   :  { %1779 = vmatprep.subr.bf16.mxu1 %v1857_v22 }
 0x688   :  { %1781 = vmatpush3.bf16.msra.mxu1 %v1994_v25 }
 0x689   :  { %1782 = vmatprep.subr.bf16.mxu1 %v1857_v22 }
 0x68c   :  { %1784 = vmatpush3.bf16.msra.mxu1 %v2006_v28 }
 0x68d   :  { %1785 = vmatprep.subr.bf16.mxu1 %v1857_v22 }
 0x690   :  { %1787 = vmatpush3.bf16.msra.mxu1 %v2015_v31 }
 0x691   :  { %1788 = vmatprep.subr.bf16.mxu1 %v1857_v22 }
 0x694   :  { %1790 = vmatpush3.bf16.msra.mxu1 %v2031_v35 }
 0x695   :  { %1791 = vmatprep.subr.bf16.mxu1 %v1857_v22 }
 0x698   :  { %1793 = vmatpush3.bf16.msra.mxu1 %v2043_v38 }
 0x699   :  { %1794 = vmatprep.subr.bf16.mxu1 %v1857_v22 }
 0x69c   :  { %1796 = vmatpush3.bf16.msra.mxu1 %v2055_v41 }
 0x69d   :  { %1797 = vmatprep.subr.bf16.mxu1 %v1857_v22 }
 0x6a0   :  { %1799 = vmatpush3.bf16.msra.mxu1 %v2067_v44 }
 0x756   :  { %v1158_v21 = vpop.f32.mrb[6].mxu1 }
 0x757   :  { %v1165_v25 = vrot.slane %v1158_v21, %v2093_v48  ;;  %v1663_v28 = vpop.f32.mrb[7].mxu1 }
 0x759   :  { %v1166_v31 = vsub.f32 %v988_v59, %v1165_v25  ;;  %v1167_v32 = vsub.f32 %v989_v57, %v1165_v25  ;;  %v1168_v40 = vsub.f32 %v990_v61, %v1165_v25  ;;  %v1169_v35 = vsub.f32 %v991_v63, %v1165_v25 }
 0x75b   :  { %v1170_v7 = vmul.f32 %v1166_v31, %v1166_v31  ;;  %v1171_v8 = vmul.f32 %v1167_v32, %v1167_v32  ;;  %v1172_v9 = vmul.f32 %v1168_v40, %v1168_v40  ;;  %v1173_v10 = vmul.f32 %v1169_v35, %v1169_v35 }
 0x75d   :  { %v1174_v38 = vadd.f32 %v1171_v8, %v1170_v7 }
 0x75f   :  { %v1175_v11 = vadd.f32 %v1174_v38, %v1172_v9 }
 0x761   :  { %v1176_v12 = vadd.f32 %v1175_v11, %v1173_v10 }
 0x763   :  { %v1177_v41 = vrot.slane %v1176_v12, 4 }
 0x765   :  { %v1178_v13 = vadd.f32 %v1177_v41, %v1176_v12 }
 0x767   :  { %v1179_v22 = vrot.slane %v1178_v13, 2 }
 0x769   :  { %v1180_v14 = vadd.f32 %v1179_v22, %v1178_v13 }
 0x76b   :  { %v1181_v44 = vrot.slane %v1180_v14, 1 }
 0x76d   :  { %v1182_v15 = vadd.f32 %v1181_v44, %v1180_v14 }
 0x76f   :  { %1697 = vmatmul.mubr.f32.vlgmr.msra.gmra.mrb[12].mxu1 %v1182_v15 }
 0x842   :  { %v1249_v16 = vpop.f32.mrb[12].mxu1 }
 0x843   :  { %v1253_v17 = vmul.f32 0.001953125, %v1249_v16  ;;  %v1698_v18 = vpop.f32.mrb[13].mxu1 }
 0x845   :  { %1702 = vmatmul.mubr.msk.f32.vlgmr.msra.gmra.mrb[24].mxu0 %vm389_vm3, %v1253_v17 }
 0x918   :  { %v1323_v19 = vpop.f32.mrb[24].mxu0 }
 0x919   :  { %v1324_v20 = vadd.f32 1e-05, %v1323_v19  ;;  %v1703_v23 = vpop.f32.mrb[25].mxu0 }
 0x91b   :  { %1854 = vrsqrt.f32 %v1324_v20 }
 0x925   :  { %v1855_v24 = vpop.eup %1854 }
 0x926   :  { %v1331_v26 = vrot.slane %v1855_v24, %v2093_v48 }
 0x928   :  { %v1332_v29 = vmul.f32 %v1331_v26, %v1166_v31  ;;  %v1333_v30 = vmul.f32 %v1331_v26, %v1167_v32  ;;  %v1334_v33 = vmul.f32 %v1331_v26, %v1168_v40  ;;  %v1335_v34 = vmul.f32 %v1331_v26, %v1169_v35 }
 0x92a   :  { %v1343_v37 = vmul.f32 %v1418_v27, %v1332_v29  ;;  %v1344_v39 = vmul.f32 %v1418_v27, %v1333_v30  ;;  %v1345_v42 = vmul.f32 %v1418_v27, %v1334_v33  ;;  %v1346_v43 = vmul.f32 %v1418_v27, %v1335_v34 }
 0x92c   :  { %v1354_v45 = vadd.f32 %v1419_v36, %v1343_v37  ;;  %v1355_v46 = vadd.f32 %v1419_v36, %v1344_v39  ;;  %v1356_v47 = vadd.f32 %v1419_v36, %v1345_v42  ;;  %v1357_v48 = vadd.f32 %v1419_v36, %v1346_v43 }
 0x92e   :  { %v1358_v49 = vmax.f32 %v1354_v45, 0.0  ;;  %v1359_v50 = vmax.f32 %v1355_v46, 0.0  ;;  %v1360_v51 = vmax.f32 %v1356_v47, 0.0  ;;  %v1361_v56 = vmax.f32 %v1357_v48, 0.0 }
 0x930   :  { %1362 = vst [vmem:[%s2337_s11] sm:$0xff] %v1358_v49  ;;  %1363 = vst [vmem:[%s2337_s11 + $0x8] sm:$0xff] %v1359_v50 }
 0x931   :  { %1364 = vst [vmem:[%s2337_s11 + $0x10] sm:$0xff] %v1360_v51  ;;  %1365 = vst [vmem:[%s2337_s11 + $0x18] sm:$0xff] %v1361_v56 }

</bundles_post_ra>
